<compile_context>
chip_gen: v7x
topology: tpu7x:2x2x1
jax: 0.10.0
libtpu: 0.0.40
codegen_flags: <defaults>
</compile_context>

<pallas_src>
import functools

import jax
import jax.numpy as jnp
from jax import lax
from jax.experimental import pallas as pl
from jax.experimental.pallas import tpu as pltpu

B_PAD = 8  # one sublane tile


# ----------------------------------------------------------------------------
# Fused kernel: gather -> bi-LSTM layer 1 -> bi-LSTM layer 2 -> FC
# ----------------------------------------------------------------------------
def textrnn_fused_kernel(
    tok_ref,        # SMEM (B*T,) int32 token ids (scalar prefetch)
    table_ref,      # (V, 8H)  embedding @ [W_ih_f1 | W_ih_r1] + [b_f1 | b_r1]
    w_hh1_ref,      # (H, 8H)  [W_hh_f1 | W_hh_r1]
    w_ih2_ref,      # (2H, 8H) [W_ih_f2 | W_ih_r2]
    b2_ref,         # (1, 8H)  [b_f2 | b_r2]   (b_ih + b_hh combined)
    w_hh_f2_ref,    # (H, 4H)
    fc_w_ref,       # (2H, Cp) zero-padded to 128 lanes
    fc_b_ref,       # (1, Cp)
    out_ref,        # (8, Cp)
    xp_ref,         # VMEM scratch (T*8, 8H)  gathered layer-1 pre-activations
    l1_ref,         # VMEM scratch (T*8, 2H)  layer-1 outputs
    *, T, B, H,
):
    f32 = jnp.float32
    H4 = 4 * H

    # ---- gate-activation constants, built once (hoisted out of the cells) ---
    # sigmoid(x) = 0.5*(tanh(0.5 x) + 1) on i/f/o lanes; plain tanh on g lanes.
    def make_consts(rows):
        lane = lax.broadcasted_iota(jnp.int32, (rows, H4), 1)
        is_g = (lane >= 2 * H) & (lane < 3 * H)
        scale = jnp.where(is_g, jnp.float32(1.0), jnp.float32(0.5))
        bias = jnp.where(is_g, jnp.float32(0.0), jnp.float32(0.5))
        return scale, bias

    sc16, bi16 = make_consts(2 * B_PAD)   # fused layer-1 cell (16, 4H)
    sc8, bi8 = make_consts(B_PAD)         # layer-2 cells       (8, 4H)

    def cell(pre, c_prev, scale, bias):
        acts = jnp.tanh(pre * scale) * scale + bias          # one EUP pass / 4H lanes
        i_g = acts[:, 0 * H:1 * H]
        f_g = acts[:, 1 * H:2 * H]
        g_g = acts[:, 2 * H:3 * H]
        o_g = acts[:, 3 * H:4 * H]
        c_new = f_g * c_prev + i_g * g_g
        h_new = o_g * jnp.tanh(c_new)
        return h_new, c_new

    # ---- in-kernel gather of pre-projected embedding rows -------------------
    # xp[t*8 + b] = table[token[b, t]] ; padded batch rows (b >= B) are zero,
    # which keeps their LSTM state identically zero (harmless, sliced off).
    pad_rows = jnp.zeros((B_PAD - B, 8 * H), f32) if B < B_PAD else None
    for t in range(T):
        rows = [table_ref[pl.ds(tok_ref[b * T + t], 1), :] for b in range(B)]
        if pad_rows is not None:
            rows = rows + [pad_rows]
        xp_ref[t * B_PAD:(t + 1) * B_PAD, :] = jnp.concatenate(rows, axis=0)

    # ---- layer 1: fused fwd+bwd recurrence -----------------------------------
    # h/c rows 0:8 = forward state (time s), rows 8:16 = backward state
    # (time T-1-s).  One (16,H)@(H,8H) MXU pass + one EUP pass per step.
    w_hh1 = w_hh1_ref[...]                                     # (H, 8H)
    h = jnp.zeros((2 * B_PAD, H), f32)
    c = jnp.zeros((2 * B_PAD, H), f32)
    for s in range(T):
        tr = T - 1 - s
        g_rec = jnp.dot(h, w_hh1, preferred_element_type=f32)  # (16, 8H)
        pre_f = xp_ref[s * B_PAD:(s + 1) * B_PAD, 0:H4] + g_rec[0:B_PAD, 0:H4]
        pre_b = (xp_ref[tr * B_PAD:(tr + 1) * B_PAD, H4:2 * H4]
                 + g_rec[B_PAD:2 * B_PAD, H4:2 * H4])
        pre = jnp.concatenate([pre_f, pre_b], axis=0)           # (16, 4H)
        h, c = cell(pre, c, sc16, bi16)
        # layer-1 output rows land in VMEM scratch (no Python-list live values)
        l1_ref[s * B_PAD:(s + 1) * B_PAD, 0:H] = h[0:B_PAD]          # fwd @ s
        l1_ref[tr * B_PAD:(tr + 1) * B_PAD, H:2 * H] = h[B_PAD:]     # bwd @ T-1-s

    # ---- layer 2 input projection: both directions in one matmul ------------
    l1_all = l1_ref[...]                                        # (T*8, 2H)
    xp2 = jnp.dot(l1_all, w_ih2_ref[...], preferred_element_type=f32) + b2_ref[...]

    # layer-2 forward: full recurrence, only the final hidden state is needed
    w_hh_f2 = w_hh_f2_ref[...]                                  # (H, 4H)
    h2 = jnp.zeros((B_PAD, H), f32)
    c2 = jnp.zeros((B_PAD, H), f32)
    for t in range(T):
        pre = (xp2[t * B_PAD:(t + 1) * B_PAD, 0:H4]
               + jnp.dot(h2, w_hh_f2, preferred_element_type=f32))
        h2, c2 = cell(pre, c2, sc8, bi8)

    # layer-2 backward: single step at t = T-1 from zero state (no W_hh term)
    pre_b2 = xp2[(T - 1) * B_PAD:T * B_PAD, H4:2 * H4]
    h2b, _ = cell(pre_b2, jnp.zeros((B_PAD, H), f32), sc8, bi8)

    # ---- final FC (lane-dense padded output tile) ----------------------------
    feats = jnp.concatenate([h2, h2b], axis=-1)                 # (8, 2H)
    out_ref[...] = (jnp.dot(feats, fc_w_ref[...], preferred_element_type=f32)
                    + fc_b_ref[...])


# ----------------------------------------------------------------------------
# Param folding (one-time) + wrapper
# ----------------------------------------------------------------------------
def fold_params(params):
    """One-time folding of PyTorch-style parameters into kernel operands."""
    assert len(params["lstm"]) == 2, "fused kernel is specialized for num_layers=2"
    l1, l2 = params["lstm"]
    emb = params["embedding"].astype(jnp.float32)
    H = l1["w_hh_f"].shape[0]
    C = params["fc_w"].shape[1]
    C_pad = max(128, ((C + 127) // 128) * 128)

    # embedding folded into layer-1 input projection (+ combined biases)
    table = (emb @ jnp.concatenate([l1["w_ih_f"], l1["w_ih_r"]], axis=1)
             + jnp.concatenate([l1["b_f"], l1["b_r"]], axis=1))          # (V, 8H)
    w_hh1 = jnp.concatenate([l1["w_hh_f"], l1["w_hh_r"]], axis=1)        # (H, 8H)
    w_ih2 = jnp.concatenate([l2["w_ih_f"], l2["w_ih_r"]], axis=1)        # (2H, 8H)
    b2 = jnp.concatenate([l2["b_f"], l2["b_r"]], axis=1)                 # (1, 8H)
    fc_w = jnp.zeros((2 * H, C_pad), jnp.float32).at[:, :C].set(params["fc_w"])
    fc_b = jnp.zeros((1, C_pad), jnp.float32).at[:, :C].set(params["fc_b"])
    return dict(table=table, w_hh1=w_hh1, w_ih2=w_ih2, b2=b2,
                w_hh_f2=l2["w_hh_f"], fc_w=fc_w, fc_b=fc_b,
                H=H, C=C, C_pad=C_pad)


def textrnn_forward(tokens, fp):
    """tokens: (B, T) int32 token ids. Returns (B, num_classes) float32."""
    B, T = tokens.shape
    H, C, C_pad = fp["H"], fp["C"], fp["C_pad"]
    assert B <= B_PAD

    tok_flat = tokens.reshape(-1).astype(jnp.int32)             # (B*T,) -> SMEM

    args = (fp["table"], fp["w_hh1"], fp["w_ih2"], fp["b2"],
            fp["w_hh_f2"], fp["fc_w"], fp["fc_b"])

    in_specs = [pl.BlockSpec(a.shape, lambda i, tok, n=a.ndim: (0,) * n)
                for a in args]

    kernel = functools.partial(textrnn_fused_kernel, T=T, B=B, H=H)

    out = pl.pallas_call(
        kernel,
        out_shape=jax.ShapeDtypeStruct((B_PAD, C_pad), jnp.float32),
        grid_spec=pltpu.PrefetchScalarGridSpec(
            num_scalar_prefetch=1,
            grid=(1,),
            in_specs=in_specs,
            out_specs=pl.BlockSpec((B_PAD, C_pad), lambda i, tok: (0, 0)),
            scratch_shapes=[
                pltpu.VMEM((T * B_PAD, 8 * H), jnp.float32),   # gathered xp
                pltpu.VMEM((T * B_PAD, 2 * H), jnp.float32),   # layer-1 output
            ],
        ),
        compiler_params=pltpu.CompilerParams(
            dimension_semantics=("arbitrary",)),
    )(tok_flat, *args)

    return out[:B, :C]


# ----------------------------------------------------------------------------
# Pure-JAX reference (for correctness check)
# ----------------------------------------------------------------------------
def ref_lstm_direction(x_tbd, w_ih, w_hh, b, reverse=False):
    if reverse:
        x_tbd = x_tbd[::-1]
    T, B, _ = x_tbd.shape
    H = w_hh.shape[0]
    h = jnp.zeros((B, H), jnp.float32)
    c = jnp.zeros((B, H), jnp.float32)
    outs = []
    for t in range(T):
        gates = x_tbd[t] @ w_ih + h @ w_hh + b
        i_g = jax.nn.sigmoid(gates[:, 0 * H:1 * H])
        f_g = jax.nn.sigmoid(gates[:, 1 * H:2 * H])
        g_g = jnp.tanh(gates[:, 2 * H:3 * H])
        o_g = jax.nn.sigmoid(gates[:, 3 * H:4 * H])
        c = f_g * c + i_g * g_g
        h = o_g * jnp.tanh(c)
        outs.append(h)
    out = jnp.stack(outs, 0)
    if reverse:
        out = out[::-1]
    return out


def ref_forward(tokens, params):
    emb = params["embedding"][tokens]
    x = jnp.transpose(emb, (1, 0, 2)).astype(jnp.float32)
    layer_in = x
    for layer in params["lstm"]:
        fwd = ref_lstm_direction(layer_in, layer["w_ih_f"], layer["w_hh_f"],
                                 layer["b_f"], reverse=False)
        bwd = ref_lstm_direction(layer_in, layer["w_ih_r"], layer["w_hh_r"],
                                 layer["b_r"], reverse=True)
        layer_in = jnp.concatenate([fwd, bwd], axis=-1)
    last = layer_in[-1]
    return last @ params["fc_w"] + params["fc_b"]


# ----------------------------------------------------------------------------
# Parameter construction (deterministic, synthetic)
# ----------------------------------------------------------------------------
def make_params(key, n_vocab, embed, hidden, num_layers, num_classes):
    keys = iter(jax.random.split(key, 64))

    def rnd(shape, scale=0.1):
        return jax.random.normal(next(keys), shape, jnp.float32) * scale

    embedding = rnd((n_vocab, embed))
    embedding = embedding.at[n_vocab - 1].set(0.0)  # padding_idx = n_vocab - 1

    lstm = []
    in_dim = embed
    for _ in range(num_layers):
        layer = {
            "w_ih_f": rnd((in_dim, 4 * hidden)),
            "w_hh_f": rnd((hidden, 4 * hidden)),
            "b_f": rnd((1, 4 * hidden)),   # b_ih + b_hh combined
            "w_ih_r": rnd((in_dim, 4 * hidden)),
            "w_hh_r": rnd((hidden, 4 * hidden)),
            "b_r": rnd((1, 4 * hidden)),
        }
        lstm.append(layer)
        in_dim = 2 * hidden  # bidirectional -> next layer sees 2H features

    fc_w = rnd((2 * hidden, num_classes))
    fc_b = rnd((1, num_classes))
    return {"embedding": embedding, "lstm": lstm, "fc_w": fc_w, "fc_b": fc_b}


# ----------------------------------------------------------------------------
if __name__ == "__main__":
    # Small shapes consistent with the module's forward.
    N_VOCAB, EMBED, HIDDEN, NUM_LAYERS, NUM_CLASSES = 50, 32, 32, 2, 4
    BATCH, SEQ = 2, 8

    key = jax.random.PRNGKey(0)
    k_param, k_tok = jax.random.split(key)
    params = make_params(k_param, N_VOCAB, EMBED, HIDDEN, NUM_LAYERS, NUM_CLASSES)
    tokens = jax.random.randint(k_tok, (BATCH, SEQ), 0, N_VOCAB, dtype=jnp.int32)

    folded = jax.tree_util.tree_map(jax.block_until_ready, fold_params(params))

    out = textrnn_forward(tokens, folded)
    out = jax.block_until_ready(out)
    assert out.shape == (BATCH, NUM_CLASSES), out.shape

    ref = jax.block_until_ready(ref_forward(tokens, params))
    assert jnp.allclose(out, ref, atol=1e-4, rtol=1e-4), (out, ref)

    print("KERNEL_OK")
</pallas_src>

<mosaic_0001>
module attributes {stable_mosaic.version = 11 : i64} {
  func.func @textrnn_fused_kernel(%arg0: i32, %arg1: memref<16xi32, #tpu.memory_space<smem>>, %arg2: memref<50x256xf32, #tpu.memory_space<vmem>>, %arg3: memref<32x256xf32, #tpu.memory_space<vmem>>, %arg4: memref<64x256xf32, #tpu.memory_space<vmem>>, %arg5: memref<1x256xf32, #tpu.memory_space<vmem>>, %arg6: memref<32x128xf32, #tpu.memory_space<vmem>>, %arg7: memref<64x128xf32, #tpu.memory_space<vmem>>, %arg8: memref<1x128xf32, #tpu.memory_space<vmem>>, %arg9: memref<8x128xf32, #tpu.memory_space<vmem>>, %arg10: memref<64x256xf32, #tpu.memory_space<vmem>>, %arg11: memref<64x64xf32, #tpu.memory_space<vmem>>) attributes {dimension_semantics = [#tpu.dimension_semantics<arbitrary>], iteration_bounds = array<i64: 1>, scalar_prefetch = 1 : i64, scratch_operands = 2 : i64, tpu.core_type = #tpu.core_type<tc>, window_params = [{pipeline_mode = #tpu.pipeline_mode<synchronous>, transform_indices = @transform_0, window_bounds = array<i64: 50, 256>}, {pipeline_mode = #tpu.pipeline_mode<synchronous>, transform_indices = @transform_1, window_bounds = array<i64: 32, 256>}, {pipeline_mode = #tpu.pipeline_mode<synchronous>, transform_indices = @transform_2, window_bounds = array<i64: 64, 256>}, {pipeline_mode = #tpu.pipeline_mode<synchronous>, transform_indices = @transform_3, window_bounds = array<i64: 1, 256>}, {pipeline_mode = #tpu.pipeline_mode<synchronous>, transform_indices = @transform_4, window_bounds = array<i64: 32, 128>}, {pipeline_mode = #tpu.pipeline_mode<synchronous>, transform_indices = @transform_5, window_bounds = array<i64: 64, 128>}, {pipeline_mode = #tpu.pipeline_mode<synchronous>, transform_indices = @transform_6, window_bounds = array<i64: 1, 128>}, {pipeline_mode = #tpu.pipeline_mode<synchronous>, transform_indices = @transform_7, window_bounds = array<i64: 8, 128>}]} {
    %0 = tpu.iota {dimensions = array<i32: 1>} : vector<16x128xi32>
    %c64_i32 = arith.constant 64 : i32
    %1 = vector.broadcast %c64_i32 : i32 to vector<16x128xi32>
    %2 = arith.cmpi sge, %0, %1 : vector<16x128xi32>
    %c96_i32 = arith.constant 96 : i32
    %3 = vector.broadcast %c96_i32 : i32 to vector<16x128xi32>
    %4 = arith.cmpi slt, %0, %3 : vector<16x128xi32>
    %5 = arith.andi %2, %4 : vector<16x128xi1>
    %cst = arith.constant 1.000000e+00 : f32
    %cst_0 = arith.constant 5.000000e-01 : f32
    %6 = vector.broadcast %cst : f32 to vector<16x128xf32>
    %7 = vector.broadcast %cst_0 : f32 to vector<16x128xf32>
    %8 = arith.select %5, %6, %7 : vector<16x128xi1>, vector<16x128xf32>
    %cst_1 = arith.constant 0.000000e+00 : f32
    %cst_2 = arith.constant 5.000000e-01 : f32
    %9 = vector.broadcast %cst_1 : f32 to vector<16x128xf32>
    %10 = vector.broadcast %cst_2 : f32 to vector<16x128xf32>
    %11 = arith.select %5, %9, %10 : vector<16x128xi1>, vector<16x128xf32>
    %12 = tpu.iota {dimensions = array<i32: 1>} : vector<8x128xi32>
    %c64_i32_3 = arith.constant 64 : i32
    %13 = vector.broadcast %c64_i32_3 : i32 to vector<8x128xi32>
    %14 = arith.cmpi sge, %12, %13 : vector<8x128xi32>
    %c96_i32_4 = arith.constant 96 : i32
    %15 = vector.broadcast %c96_i32_4 : i32 to vector<8x128xi32>
    %16 = arith.cmpi slt, %12, %15 : vector<8x128xi32>
    %17 = arith.andi %14, %16 : vector<8x128xi1>
    %cst_5 = arith.constant 1.000000e+00 : f32
    %cst_6 = arith.constant 5.000000e-01 : f32
    %18 = vector.broadcast %cst_5 : f32 to vector<8x128xf32>
    %19 = vector.broadcast %cst_6 : f32 to vector<8x128xf32>
    %20 = arith.select %17, %18, %19 : vector<8x128xi1>, vector<8x128xf32>
    %cst_7 = arith.constant 0.000000e+00 : f32
    %cst_8 = arith.constant 5.000000e-01 : f32
    %21 = vector.broadcast %cst_7 : f32 to vector<8x128xf32>
    %22 = vector.broadcast %cst_8 : f32 to vector<8x128xf32>
    %23 = arith.select %17, %21, %22 : vector<8x128xi1>, vector<8x128xf32>
    %cst_9 = arith.constant 0.000000e+00 : f32
    %24 = vector.broadcast %cst_9 : f32 to vector<6x256xf32>
    %c0 = arith.constant 0 : index
    %25 = memref.load %arg1[%c0] : memref<16xi32, #tpu.memory_space<smem>>
    %26 = arith.index_cast %25 : i32 to index
    %c0_10 = arith.constant 0 : index
    %27 = vector.load %arg2[%26, %c0_10] : memref<50x256xf32, #tpu.memory_space<vmem>>, vector<1x256xf32>
    %c8 = arith.constant 8 : index
    %28 = memref.load %arg1[%c8] : memref<16xi32, #tpu.memory_space<smem>>
    %29 = arith.index_cast %28 : i32 to index
    %c0_11 = arith.constant 0 : index
    %30 = vector.load %arg2[%29, %c0_11] : memref<50x256xf32, #tpu.memory_space<vmem>>, vector<1x256xf32>
    %31 = tpu.concatenate %27, %30, %24 in 0 : vector<1x256xf32>, vector<1x256xf32>, vector<6x256xf32> -> vector<8x256xf32>
    %c0_12 = arith.constant 0 : index
    %c0_13 = arith.constant 0 : index
    %32 = vector.load %arg10[%c0_12, %c0_13] : memref<64x256xf32, #tpu.memory_space<vmem>>, vector<8x256xf32>
    tpu.vector_store %arg10[%c0_12, %c0_13], %31 {strides = array<i32>} : memref<64x256xf32, #tpu.memory_space<vmem>>, vector<8x256xf32>,
    %c1 = arith.constant 1 : index
    %33 = memref.load %arg1[%c1] : memref<16xi32, #tpu.memory_space<smem>>
    %34 = arith.index_cast %33 : i32 to index
    %c0_14 = arith.constant 0 : index
    %35 = vector.load %arg2[%34, %c0_14] : memref<50x256xf32, #tpu.memory_space<vmem>>, vector<1x256xf32>
    %c9 = arith.constant 9 : index
    %36 = memref.load %arg1[%c9] : memref<16xi32, #tpu.memory_space<smem>>
    %37 = arith.index_cast %36 : i32 to index
    %c0_15 = arith.constant 0 : index
    %38 = vector.load %arg2[%37, %c0_15] : memref<50x256xf32, #tpu.memory_space<vmem>>, vector<1x256xf32>
    %39 = tpu.concatenate %35, %38, %24 in 0 : vector<1x256xf32>, vector<1x256xf32>, vector<6x256xf32> -> vector<8x256xf32>
    %c8_16 = arith.constant 8 : index
    %c0_17 = arith.constant 0 : index
    %40 = vector.load %arg10[%c8_16, %c0_17] : memref<64x256xf32, #tpu.memory_space<vmem>>, vector<8x256xf32>
    tpu.vector_store %arg10[%c8_16, %c0_17], %39 {strides = array<i32>} : memref<64x256xf32, #tpu.memory_space<vmem>>, vector<8x256xf32>,
    %c2 = arith.constant 2 : index
    %41 = memref.load %arg1[%c2] : memref<16xi32, #tpu.memory_space<smem>>
    %42 = arith.index_cast %41 : i32 to index
    %c0_18 = arith.constant 0 : index
    %43 = vector.load %arg2[%42, %c0_18] : memref<50x256xf32, #tpu.memory_space<vmem>>, vector<1x256xf32>
    %c10 = arith.constant 10 : index
    %44 = memref.load %arg1[%c10] : memref<16xi32, #tpu.memory_space<smem>>
    %45 = arith.index_cast %44 : i32 to index
    %c0_19 = arith.constant 0 : index
    %46 = vector.load %arg2[%45, %c0_19] : memref<50x256xf32, #tpu.memory_space<vmem>>, vector<1x256xf32>
    %47 = tpu.concatenate %43, %46, %24 in 0 : vector<1x256xf32>, vector<1x256xf32>, vector<6x256xf32> -> vector<8x256xf32>
    %c16 = arith.constant 16 : index
    %c0_20 = arith.constant 0 : index
    %48 = vector.load %arg10[%c16, %c0_20] : memref<64x256xf32, #tpu.memory_space<vmem>>, vector<8x256xf32>
    tpu.vector_store %arg10[%c16, %c0_20], %47 {strides = array<i32>} : memref<64x256xf32, #tpu.memory_space<vmem>>, vector<8x256xf32>,
    %c3 = arith.constant 3 : index
    %49 = memref.load %arg1[%c3] : memref<16xi32, #tpu.memory_space<smem>>
    %50 = arith.index_cast %49 : i32 to index
    %c0_21 = arith.constant 0 : index
    %51 = vector.load %arg2[%50, %c0_21] : memref<50x256xf32, #tpu.memory_space<vmem>>, vector<1x256xf32>
    %c11 = arith.constant 11 : index
    %52 = memref.load %arg1[%c11] : memref<16xi32, #tpu.memory_space<smem>>
    %53 = arith.index_cast %52 : i32 to index
    %c0_22 = arith.constant 0 : index
    %54 = vector.load %arg2[%53, %c0_22] : memref<50x256xf32, #tpu.memory_space<vmem>>, vector<1x256xf32>
    %55 = tpu.concatenate %51, %54, %24 in 0 : vector<1x256xf32>, vector<1x256xf32>, vector<6x256xf32> -> vector<8x256xf32>
    %c24 = arith.constant 24 : index
    %c0_23 = arith.constant 0 : index
    %56 = vector.load %arg10[%c24, %c0_23] : memref<64x256xf32, #tpu.memory_space<vmem>>, vector<8x256xf32>
    tpu.vector_store %arg10[%c24, %c0_23], %55 {strides = array<i32>} : memref<64x256xf32, #tpu.memory_space<vmem>>, vector<8x256xf32>,
    %c4 = arith.constant 4 : index
    %57 = memref.load %arg1[%c4] : memref<16xi32, #tpu.memory_space<smem>>
    %58 = arith.index_cast %57 : i32 to index
    %c0_24 = arith.constant 0 : index
    %59 = vector.load %arg2[%58, %c0_24] : memref<50x256xf32, #tpu.memory_space<vmem>>, vector<1x256xf32>
    %c12 = arith.constant 12 : index
    %60 = memref.load %arg1[%c12] : memref<16xi32, #tpu.memory_space<smem>>
    %61 = arith.index_cast %60 : i32 to index
    %c0_25 = arith.constant 0 : index
    %62 = vector.load %arg2[%61, %c0_25] : memref<50x256xf32, #tpu.memory_space<vmem>>, vector<1x256xf32>
    %63 = tpu.concatenate %59, %62, %24 in 0 : vector<1x256xf32>, vector<1x256xf32>, vector<6x256xf32> -> vector<8x256xf32>
    %c32 = arith.constant 32 : index
    %c0_26 = arith.constant 0 : index
    %64 = vector.load %arg10[%c32, %c0_26] : memref<64x256xf32, #tpu.memory_space<vmem>>, vector<8x256xf32>
    tpu.vector_store %arg10[%c32, %c0_26], %63 {strides = array<i32>} : memref<64x256xf32, #tpu.memory_space<vmem>>, vector<8x256xf32>,
    %c5 = arith.constant 5 : index
    %65 = memref.load %arg1[%c5] : memref<16xi32, #tpu.memory_space<smem>>
    %66 = arith.index_cast %65 : i32 to index
    %c0_27 = arith.constant 0 : index
    %67 = vector.load %arg2[%66, %c0_27] : memref<50x256xf32, #tpu.memory_space<vmem>>, vector<1x256xf32>
    %c13 = arith.constant 13 : index
    %68 = memref.load %arg1[%c13] : memref<16xi32, #tpu.memory_space<smem>>
    %69 = arith.index_cast %68 : i32 to index
    %c0_28 = arith.constant 0 : index
    %70 = vector.load %arg2[%69, %c0_28] : memref<50x256xf32, #tpu.memory_space<vmem>>, vector<1x256xf32>
    %71 = tpu.concatenate %67, %70, %24 in 0 : vector<1x256xf32>, vector<1x256xf32>, vector<6x256xf32> -> vector<8x256xf32>
    %c40 = arith.constant 40 : index
    %c0_29 = arith.constant 0 : index
    %72 = vector.load %arg10[%c40, %c0_29] : memref<64x256xf32, #tpu.memory_space<vmem>>, vector<8x256xf32>
    tpu.vector_store %arg10[%c40, %c0_29], %71 {strides = array<i32>} : memref<64x256xf32, #tpu.memory_space<vmem>>, vector<8x256xf32>,
    %c6 = arith.constant 6 : index
    %73 = memref.load %arg1[%c6] : memref<16xi32, #tpu.memory_space<smem>>
    %74 = arith.index_cast %73 : i32 to index
    %c0_30 = arith.constant 0 : index
    %75 = vector.load %arg2[%74, %c0_30] : memref<50x256xf32, #tpu.memory_space<vmem>>, vector<1x256xf32>
    %c14 = arith.constant 14 : index
    %76 = memref.load %arg1[%c14] : memref<16xi32, #tpu.memory_space<smem>>
    %77 = arith.index_cast %76 : i32 to index
    %c0_31 = arith.constant 0 : index
    %78 = vector.load %arg2[%77, %c0_31] : memref<50x256xf32, #tpu.memory_space<vmem>>, vector<1x256xf32>
    %79 = tpu.concatenate %75, %78, %24 in 0 : vector<1x256xf32>, vector<1x256xf32>, vector<6x256xf32> -> vector<8x256xf32>
    %c48 = arith.constant 48 : index
    %c0_32 = arith.constant 0 : index
    %80 = vector.load %arg10[%c48, %c0_32] : memref<64x256xf32, #tpu.memory_space<vmem>>, vector<8x256xf32>
    tpu.vector_store %arg10[%c48, %c0_32], %79 {strides = array<i32>} : memref<64x256xf32, #tpu.memory_space<vmem>>, vector<8x256xf32>,
    %c7 = arith.constant 7 : index
    %81 = memref.load %arg1[%c7] : memref<16xi32, #tpu.memory_space<smem>>
    %82 = arith.index_cast %81 : i32 to index
    %c0_33 = arith.constant 0 : index
    %83 = vector.load %arg2[%82, %c0_33] : memref<50x256xf32, #tpu.memory_space<vmem>>, vector<1x256xf32>
    %c15 = arith.constant 15 : index
    %84 = memref.load %arg1[%c15] : memref<16xi32, #tpu.memory_space<smem>>
    %85 = arith.index_cast %84 : i32 to index
    %c0_34 = arith.constant 0 : index
    %86 = vector.load %arg2[%85, %c0_34] : memref<50x256xf32, #tpu.memory_space<vmem>>, vector<1x256xf32>
    %87 = tpu.concatenate %83, %86, %24 in 0 : vector<1x256xf32>, vector<1x256xf32>, vector<6x256xf32> -> vector<8x256xf32>
    %c56 = arith.constant 56 : index
    %c0_35 = arith.constant 0 : index
    %88 = vector.load %arg10[%c56, %c0_35] : memref<64x256xf32, #tpu.memory_space<vmem>>, vector<8x256xf32>
    tpu.vector_store %arg10[%c56, %c0_35], %87 {strides = array<i32>} : memref<64x256xf32, #tpu.memory_space<vmem>>, vector<8x256xf32>,
    %c0_36 = arith.constant 0 : index
    %c0_37 = arith.constant 0 : index
    %89 = vector.load %arg3[%c0_36, %c0_37] : memref<32x256xf32, #tpu.memory_space<vmem>>, vector<32x256xf32>
    %cst_38 = arith.constant 0.000000e+00 : f32
    %90 = vector.broadcast %cst_38 : f32 to vector<16x32xf32>
    %cst_39 = arith.constant 0.000000e+00 : f32
    %91 = vector.broadcast %cst_39 : f32 to vector<16x32xf32>
    %cst_40 = arith.constant dense<0.000000e+00> : vector<16x256xf32>
    %92 = tpu.matmul %90, %89, %cst_40 {dimension_numbers = #tpu.dot_dimension_numbers<[1], [0], [0], [1], [0, 0, 1, 1], [], []>} : vector<16x32xf32>, vector<32x256xf32>, vector<16x256xf32> -> vector<16x256xf32>
    %c0_41 = arith.constant 0 : index
    %c0_42 = arith.constant 0 : index
    %93 = vector.load %arg10[%c0_41, %c0_42] : memref<64x256xf32, #tpu.memory_space<vmem>>, vector<8x128xf32>
    %94 = vector.extract_strided_slice %92 {offsets = [0, 0], sizes = [8, 128], strides = [1, 1]} : vector<16x256xf32> to vector<8x128xf32>
    %95 = arith.addf %93, %94 : vector<8x128xf32>
    %c56_43 = arith.constant 56 : index
    %c128 = arith.constant 128 : index
    %96 = vector.load %arg10[%c56_43, %c128] : memref<64x256xf32, #tpu.memory_space<vmem>>, vector<8x128xf32>
    %97 = vector.extract_strided_slice %92 {offsets = [8, 128], sizes = [8, 128], strides = [1, 1]} : vector<16x256xf32> to vector<8x128xf32>
    %98 = arith.addf %96, %97 : vector<8x128xf32>
    %99 = tpu.concatenate %95, %98 in 0 : vector<8x128xf32>, vector<8x128xf32> -> vector<16x128xf32>
    %100 = arith.mulf %99, %8 : vector<16x128xf32>
    %101 = math.tanh %100 : vector<16x128xf32>
    %102 = arith.mulf %101, %8 : vector<16x128xf32>
    %103 = arith.addf %102, %11 : vector<16x128xf32>
    %104 = vector.extract_strided_slice %103 {offsets = [0, 0], sizes = [16, 32], strides = [1, 1]} : vector<16x128xf32> to vector<16x32xf32>
    %105 = vector.extract_strided_slice %103 {offsets = [0, 32], sizes = [16, 32], strides = [1, 1]} : vector<16x128xf32> to vector<16x32xf32>
    %106 = vector.extract_strided_slice %103 {offsets = [0, 64], sizes = [16, 32], strides = [1, 1]} : vector<16x128xf32> to vector<16x32xf32>
    %107 = vector.extract_strided_slice %103 {offsets = [0, 96], sizes = [16, 32], strides = [1, 1]} : vector<16x128xf32> to vector<16x32xf32>
    %108 = arith.mulf %105, %91 : vector<16x32xf32>
    %109 = arith.mulf %104, %106 : vector<16x32xf32>
    %110 = arith.addf %108, %109 : vector<16x32xf32>
    %111 = math.tanh %110 : vector<16x32xf32>
    %112 = arith.mulf %107, %111 : vector<16x32xf32>
    %113 = vector.extract_strided_slice %112 {offsets = [0, 0], sizes = [8, 32], strides = [1, 1]} : vector<16x32xf32> to vector<8x32xf32>
    %c0_44 = arith.constant 0 : index
    %c0_45 = arith.constant 0 : index
    %114 = vector.load %arg11[%c0_44, %c0_45] : memref<64x64xf32, #tpu.memory_space<vmem>>, vector<8x32xf32>
    tpu.vector_store %arg11[%c0_44, %c0_45], %113 {strides = array<i32>} : memref<64x64xf32, #tpu.memory_space<vmem>>, vector<8x32xf32>,
    %115 = vector.extract_strided_slice %112 {offsets = [8, 0], sizes = [8, 32], strides = [1, 1]} : vector<16x32xf32> to vector<8x32xf32>
    %c56_46 = arith.constant 56 : index
    %c32_47 = arith.constant 32 : index
    %116 = vector.load %arg11[%c56_46, %c32_47] : memref<64x64xf32, #tpu.memory_space<vmem>>, vector<8x32xf32>
    tpu.vector_store %arg11[%c56_46, %c32_47], %115 {strides = array<i32>} : memref<64x64xf32, #tpu.memory_space<vmem>>, vector<8x32xf32>,
    %cst_48 = arith.constant dense<0.000000e+00> : vector<16x256xf32>
    %117 = tpu.matmul %112, %89, %cst_48 {dimension_numbers = #tpu.dot_dimension_numbers<[1], [0], [0], [1], [0, 0, 1, 1], [], []>} : vector<16x32xf32>, vector<32x256xf32>, vector<16x256xf32> -> vector<16x256xf32>
    %c8_49 = arith.constant 8 : index
    %c0_50 = arith.constant 0 : index
    %118 = vector.load %arg10[%c8_49, %c0_50] : memref<64x256xf32, #tpu.memory_space<vmem>>, vector<8x128xf32>
    %119 = vector.extract_strided_slice %117 {offsets = [0, 0], sizes = [8, 128], strides = [1, 1]} : vector<16x256xf32> to vector<8x128xf32>
    %120 = arith.addf %118, %119 : vector<8x128xf32>
    %c48_51 = arith.constant 48 : index
    %c128_52 = arith.constant 128 : index
    %121 = vector.load %arg10[%c48_51, %c128_52] : memref<64x256xf32, #tpu.memory_space<vmem>>, vector<8x128xf32>
    %122 = vector.extract_strided_slice %117 {offsets = [8, 128], sizes = [8, 128], strides = [1, 1]} : vector<16x256xf32> to vector<8x128xf32>
    %123 = arith.addf %121, %122 : vector<8x128xf32>
    %124 = tpu.concatenate %120, %123 in 0 : vector<8x128xf32>, vector<8x128xf32> -> vector<16x128xf32>
    %125 = arith.mulf %124, %8 : vector<16x128xf32>
    %126 = math.tanh %125 : vector<16x128xf32>
    %127 = arith.mulf %126, %8 : vector<16x128xf32>
    %128 = arith.addf %127, %11 : vector<16x128xf32>
    %129 = vector.extract_strided_slice %128 {offsets = [0, 0], sizes = [16, 32], strides = [1, 1]} : vector<16x128xf32> to vector<16x32xf32>
    %130 = vector.extract_strided_slice %128 {offsets = [0, 32], sizes = [16, 32], strides = [1, 1]} : vector<16x128xf32> to vector<16x32xf32>
    %131 = vector.extract_strided_slice %128 {offsets = [0, 64], sizes = [16, 32], strides = [1, 1]} : vector<16x128xf32> to vector<16x32xf32>
    %132 = vector.extract_strided_slice %128 {offsets = [0, 96], sizes = [16, 32], strides = [1, 1]} : vector<16x128xf32> to vector<16x32xf32>
    %133 = arith.mulf %130, %110 : vector<16x32xf32>
    %134 = arith.mulf %129, %131 : vector<16x32xf32>
    %135 = arith.addf %133, %134 : vector<16x32xf32>
    %136 = math.tanh %135 : vector<16x32xf32>
    %137 = arith.mulf %132, %136 : vector<16x32xf32>
    %138 = vector.extract_strided_slice %137 {offsets = [0, 0], sizes = [8, 32], strides = [1, 1]} : vector<16x32xf32> to vector<8x32xf32>
    %c8_53 = arith.constant 8 : index
    %c0_54 = arith.constant 0 : index
    %139 = vector.load %arg11[%c8_53, %c0_54] : memref<64x64xf32, #tpu.memory_space<vmem>>, vector<8x32xf32>
    tpu.vector_store %arg11[%c8_53, %c0_54], %138 {strides = array<i32>} : memref<64x64xf32, #tpu.memory_space<vmem>>, vector<8x32xf32>,
    %140 = vector.extract_strided_slice %137 {offsets = [8, 0], sizes = [8, 32], strides = [1, 1]} : vector<16x32xf32> to vector<8x32xf32>
    %c48_55 = arith.constant 48 : index
    %c32_56 = arith.constant 32 : index
    %141 = vector.load %arg11[%c48_55, %c32_56] : memref<64x64xf32, #tpu.memory_space<vmem>>, vector<8x32xf32>
    tpu.vector_store %arg11[%c48_55, %c32_56], %140 {strides = array<i32>} : memref<64x64xf32, #tpu.memory_space<vmem>>, vector<8x32xf32>,
    %cst_57 = arith.constant dense<0.000000e+00> : vector<16x256xf32>
    %142 = tpu.matmul %137, %89, %cst_57 {dimension_numbers = #tpu.dot_dimension_numbers<[1], [0], [0], [1], [0, 0, 1, 1], [], []>} : vector<16x32xf32>, vector<32x256xf32>, vector<16x256xf32> -> vector<16x256xf32>
    %c16_58 = arith.constant 16 : index
    %c0_59 = arith.constant 0 : index
    %143 = vector.load %arg10[%c16_58, %c0_59] : memref<64x256xf32, #tpu.memory_space<vmem>>, vector<8x128xf32>
    %144 = vector.extract_strided_slice %142 {offsets = [0, 0], sizes = [8, 128], strides = [1, 1]} : vector<16x256xf32> to vector<8x128xf32>
    %145 = arith.addf %143, %144 : vector<8x128xf32>
    %c40_60 = arith.constant 40 : index
    %c128_61 = arith.constant 128 : index
    %146 = vector.load %arg10[%c40_60, %c128_61] : memref<64x256xf32, #tpu.memory_space<vmem>>, vector<8x128xf32>
    %147 = vector.extract_strided_slice %142 {offsets = [8, 128], sizes = [8, 128], strides = [1, 1]} : vector<16x256xf32> to vector<8x128xf32>
    %148 = arith.addf %146, %147 : vector<8x128xf32>
    %149 = tpu.concatenate %145, %148 in 0 : vector<8x128xf32>, vector<8x128xf32> -> vector<16x128xf32>
    %150 = arith.mulf %149, %8 : vector<16x128xf32>
    %151 = math.tanh %150 : vector<16x128xf32>
    %152 = arith.mulf %151, %8 : vector<16x128xf32>
    %153 = arith.addf %152, %11 : vector<16x128xf32>
    %154 = vector.extract_strided_slice %153 {offsets = [0, 0], sizes = [16, 32], strides = [1, 1]} : vector<16x128xf32> to vector<16x32xf32>
    %155 = vector.extract_strided_slice %153 {offsets = [0, 32], sizes = [16, 32], strides = [1, 1]} : vector<16x128xf32> to vector<16x32xf32>
    %156 = vector.extract_strided_slice %153 {offsets = [0, 64], sizes = [16, 32], strides = [1, 1]} : vector<16x128xf32> to vector<16x32xf32>
    %157 = vector.extract_strided_slice %153 {offsets = [0, 96], sizes = [16, 32], strides = [1, 1]} : vector<16x128xf32> to vector<16x32xf32>
    %158 = arith.mulf %155, %135 : vector<16x32xf32>
    %159 = arith.mulf %154, %156 : vector<16x32xf32>
    %160 = arith.addf %158, %159 : vector<16x32xf32>
    %161 = math.tanh %160 : vector<16x32xf32>
    %162 = arith.mulf %157, %161 : vector<16x32xf32>
    %163 = vector.extract_strided_slice %162 {offsets = [0, 0], sizes = [8, 32], strides = [1, 1]} : vector<16x32xf32> to vector<8x32xf32>
    %c16_62 = arith.constant 16 : index
    %c0_63 = arith.constant 0 : index
    %164 = vector.load %arg11[%c16_62, %c0_63] : memref<64x64xf32, #tpu.memory_space<vmem>>, vector<8x32xf32>
    tpu.vector_store %arg11[%c16_62, %c0_63], %163 {strides = array<i32>} : memref<64x64xf32, #tpu.memory_space<vmem>>, vector<8x32xf32>,
    %165 = vector.extract_strided_slice %162 {offsets = [8, 0], sizes = [8, 32], strides = [1, 1]} : vector<16x32xf32> to vector<8x32xf32>
    %c40_64 = arith.constant 40 : index
    %c32_65 = arith.constant 32 : index
    %166 = vector.load %arg11[%c40_64, %c32_65] : memref<64x64xf32, #tpu.memory_space<vmem>>, vector<8x32xf32>
    tpu.vector_store %arg11[%c40_64, %c32_65], %165 {strides = array<i32>} : memref<64x64xf32, #tpu.memory_space<vmem>>, vector<8x32xf32>,
    %cst_66 = arith.constant dense<0.000000e+00> : vector<16x256xf32>
    %167 = tpu.matmul %162, %89, %cst_66 {dimension_numbers = #tpu.dot_dimension_numbers<[1], [0], [0], [1], [0, 0, 1, 1], [], []>} : vector<16x32xf32>, vector<32x256xf32>, vector<16x256xf32> -> vector<16x256xf32>
    %c24_67 = arith.constant 24 : index
    %c0_68 = arith.constant 0 : index
    %168 = vector.load %arg10[%c24_67, %c0_68] : memref<64x256xf32, #tpu.memory_space<vmem>>, vector<8x128xf32>
    %169 = vector.extract_strided_slice %167 {offsets = [0, 0], sizes = [8, 128], strides = [1, 1]} : vector<16x256xf32> to vector<8x128xf32>
    %170 = arith.addf %168, %169 : vector<8x128xf32>
    %c32_69 = arith.constant 32 : index
    %c128_70 = arith.constant 128 : index
    %171 = vector.load %arg10[%c32_69, %c128_70] : memref<64x256xf32, #tpu.memory_space<vmem>>, vector<8x128xf32>
    %172 = vector.extract_strided_slice %167 {offsets = [8, 128], sizes = [8, 128], strides = [1, 1]} : vector<16x256xf32> to vector<8x128xf32>
    %173 = arith.addf %171, %172 : vector<8x128xf32>
    %174 = tpu.concatenate %170, %173 in 0 : vector<8x128xf32>, vector<8x128xf32> -> vector<16x128xf32>
    %175 = arith.mulf %174, %8 : vector<16x128xf32>
    %176 = math.tanh %175 : vector<16x128xf32>
    %177 = arith.mulf %176, %8 : vector<16x128xf32>
    %178 = arith.addf %177, %11 : vector<16x128xf32>
    %179 = vector.extract_strided_slice %178 {offsets = [0, 0], sizes = [16, 32], strides = [1, 1]} : vector<16x128xf32> to vector<16x32xf32>
    %180 = vector.extract_strided_slice %178 {offsets = [0, 32], sizes = [16, 32], strides = [1, 1]} : vector<16x128xf32> to vector<16x32xf32>
    %181 = vector.extract_strided_slice %178 {offsets = [0, 64], sizes = [16, 32], strides = [1, 1]} : vector<16x128xf32> to vector<16x32xf32>
    %182 = vector.extract_strided_slice %178 {offsets = [0, 96], sizes = [16, 32], strides = [1, 1]} : vector<16x128xf32> to vector<16x32xf32>
    %183 = arith.mulf %180, %160 : vector<16x32xf32>
    %184 = arith.mulf %179, %181 : vector<16x32xf32>
    %185 = arith.addf %183, %184 : vector<16x32xf32>
    %186 = math.tanh %185 : vector<16x32xf32>
    %187 = arith.mulf %182, %186 : vector<16x32xf32>
    %188 = vector.extract_strided_slice %187 {offsets = [0, 0], sizes = [8, 32], strides = [1, 1]} : vector<16x32xf32> to vector<8x32xf32>
    %c24_71 = arith.constant 24 : index
    %c0_72 = arith.constant 0 : index
    %189 = vector.load %arg11[%c24_71, %c0_72] : memref<64x64xf32, #tpu.memory_space<vmem>>, vector<8x32xf32>
    tpu.vector_store %arg11[%c24_71, %c0_72], %188 {strides = array<i32>} : memref<64x64xf32, #tpu.memory_space<vmem>>, vector<8x32xf32>,
    %190 = vector.extract_strided_slice %187 {offsets = [8, 0], sizes = [8, 32], strides = [1, 1]} : vector<16x32xf32> to vector<8x32xf32>
    %c32_73 = arith.constant 32 : index
    %c32_74 = arith.constant 32 : index
    %191 = vector.load %arg11[%c32_73, %c32_74] : memref<64x64xf32, #tpu.memory_space<vmem>>, vector<8x32xf32>
    tpu.vector_store %arg11[%c32_73, %c32_74], %190 {strides = array<i32>} : memref<64x64xf32, #tpu.memory_space<vmem>>, vector<8x32xf32>,
    %cst_75 = arith.constant dense<0.000000e+00> : vector<16x256xf32>
    %192 = tpu.matmul %187, %89, %cst_75 {dimension_numbers = #tpu.dot_dimension_numbers<[1], [0], [0], [1], [0, 0, 1, 1], [], []>} : vector<16x32xf32>, vector<32x256xf32>, vector<16x256xf32> -> vector<16x256xf32>
    %c32_76 = arith.constant 32 : index
    %c0_77 = arith.constant 0 : index
    %193 = vector.load %arg10[%c32_76, %c0_77] : memref<64x256xf32, #tpu.memory_space<vmem>>, vector<8x128xf32>
    %194 = vector.extract_strided_slice %192 {offsets = [0, 0], sizes = [8, 128], strides = [1, 1]} : vector<16x256xf32> to vector<8x128xf32>
    %195 = arith.addf %193, %194 : vector<8x128xf32>
    %c24_78 = arith.constant 24 : index
    %c128_79 = arith.constant 128 : index
    %196 = vector.load %arg10[%c24_78, %c128_79] : memref<64x256xf32, #tpu.memory_space<vmem>>, vector<8x128xf32>
    %197 = vector.extract_strided_slice %192 {offsets = [8, 128], sizes = [8, 128], strides = [1, 1]} : vector<16x256xf32> to vector<8x128xf32>
    %198 = arith.addf %196, %197 : vector<8x128xf32>
    %199 = tpu.concatenate %195, %198 in 0 : vector<8x128xf32>, vector<8x128xf32> -> vector<16x128xf32>
    %200 = arith.mulf %199, %8 : vector<16x128xf32>
    %201 = math.tanh %200 : vector<16x128xf32>
    %202 = arith.mulf %201, %8 : vector<16x128xf32>
    %203 = arith.addf %202, %11 : vector<16x128xf32>
    %204 = vector.extract_strided_slice %203 {offsets = [0, 0], sizes = [16, 32], strides = [1, 1]} : vector<16x128xf32> to vector<16x32xf32>
    %205 = vector.extract_strided_slice %203 {offsets = [0, 32], sizes = [16, 32], strides = [1, 1]} : vector<16x128xf32> to vector<16x32xf32>
    %206 = vector.extract_strided_slice %203 {offsets = [0, 64], sizes = [16, 32], strides = [1, 1]} : vector<16x128xf32> to vector<16x32xf32>
    %207 = vector.extract_strided_slice %203 {offsets = [0, 96], sizes = [16, 32], strides = [1, 1]} : vector<16x128xf32> to vector<16x32xf32>
    %208 = arith.mulf %205, %185 : vector<16x32xf32>
    %209 = arith.mulf %204, %206 : vector<16x32xf32>
    %210 = arith.addf %208, %209 : vector<16x32xf32>
    %211 = math.tanh %210 : vector<16x32xf32>
    %212 = arith.mulf %207, %211 : vector<16x32xf32>
    %213 = vector.extract_strided_slice %212 {offsets = [0, 0], sizes = [8, 32], strides = [1, 1]} : vector<16x32xf32> to vector<8x32xf32>
    %c32_80 = arith.constant 32 : index
    %c0_81 = arith.constant 0 : index
    %214 = vector.load %arg11[%c32_80, %c0_81] : memref<64x64xf32, #tpu.memory_space<vmem>>, vector<8x32xf32>
    tpu.vector_store %arg11[%c32_80, %c0_81], %213 {strides = array<i32>} : memref<64x64xf32, #tpu.memory_space<vmem>>, vector<8x32xf32>,
    %215 = vector.extract_strided_slice %212 {offsets = [8, 0], sizes = [8, 32], strides = [1, 1]} : vector<16x32xf32> to vector<8x32xf32>
    %c24_82 = arith.constant 24 : index
    %c32_83 = arith.constant 32 : index
    %216 = vector.load %arg11[%c24_82, %c32_83] : memref<64x64xf32, #tpu.memory_space<vmem>>, vector<8x32xf32>
    tpu.vector_store %arg11[%c24_82, %c32_83], %215 {strides = array<i32>} : memref<64x64xf32, #tpu.memory_space<vmem>>, vector<8x32xf32>,
    %cst_84 = arith.constant dense<0.000000e+00> : vector<16x256xf32>
    %217 = tpu.matmul %212, %89, %cst_84 {dimension_numbers = #tpu.dot_dimension_numbers<[1], [0], [0], [1], [0, 0, 1, 1], [], []>} : vector<16x32xf32>, vector<32x256xf32>, vector<16x256xf32> -> vector<16x256xf32>
    %c40_85 = arith.constant 40 : index
    %c0_86 = arith.constant 0 : index
    %218 = vector.load %arg10[%c40_85, %c0_86] : memref<64x256xf32, #tpu.memory_space<vmem>>, vector<8x128xf32>
    %219 = vector.extract_strided_slice %217 {offsets = [0, 0], sizes = [8, 128], strides = [1, 1]} : vector<16x256xf32> to vector<8x128xf32>
    %220 = arith.addf %218, %219 : vector<8x128xf32>
    %c16_87 = arith.constant 16 : index
    %c128_88 = arith.constant 128 : index
    %221 = vector.load %arg10[%c16_87, %c128_88] : memref<64x256xf32, #tpu.memory_space<vmem>>, vector<8x128xf32>
    %222 = vector.extract_strided_slice %217 {offsets = [8, 128], sizes = [8, 128], strides = [1, 1]} : vector<16x256xf32> to vector<8x128xf32>
    %223 = arith.addf %221, %222 : vector<8x128xf32>
    %224 = tpu.concatenate %220, %223 in 0 : vector<8x128xf32>, vector<8x128xf32> -> vector<16x128xf32>
    %225 = arith.mulf %224, %8 : vector<16x128xf32>
    %226 = math.tanh %225 : vector<16x128xf32>
    %227 = arith.mulf %226, %8 : vector<16x128xf32>
    %228 = arith.addf %227, %11 : vector<16x128xf32>
    %229 = vector.extract_strided_slice %228 {offsets = [0, 0], sizes = [16, 32], strides = [1, 1]} : vector<16x128xf32> to vector<16x32xf32>
    %230 = vector.extract_strided_slice %228 {offsets = [0, 32], sizes = [16, 32], strides = [1, 1]} : vector<16x128xf32> to vector<16x32xf32>
    %231 = vector.extract_strided_slice %228 {offsets = [0, 64], sizes = [16, 32], strides = [1, 1]} : vector<16x128xf32> to vector<16x32xf32>
    %232 = vector.extract_strided_slice %228 {offsets = [0, 96], sizes = [16, 32], strides = [1, 1]} : vector<16x128xf32> to vector<16x32xf32>
    %233 = arith.mulf %230, %210 : vector<16x32xf32>
    %234 = arith.mulf %229, %231 : vector<16x32xf32>
    %235 = arith.addf %233, %234 : vector<16x32xf32>
    %236 = math.tanh %235 : vector<16x32xf32>
    %237 = arith.mulf %232, %236 : vector<16x32xf32>
    %238 = vector.extract_strided_slice %237 {offsets = [0, 0], sizes = [8, 32], strides = [1, 1]} : vector<16x32xf32> to vector<8x32xf32>
    %c40_89 = arith.constant 40 : index
    %c0_90 = arith.constant 0 : index
    %239 = vector.load %arg11[%c40_89, %c0_90] : memref<64x64xf32, #tpu.memory_space<vmem>>, vector<8x32xf32>
    tpu.vector_store %arg11[%c40_89, %c0_90], %238 {strides = array<i32>} : memref<64x64xf32, #tpu.memory_space<vmem>>, vector<8x32xf32>,
    %240 = vector.extract_strided_slice %237 {offsets = [8, 0], sizes = [8, 32], strides = [1, 1]} : vector<16x32xf32> to vector<8x32xf32>
    %c16_91 = arith.constant 16 : index
    %c32_92 = arith.constant 32 : index
    %241 = vector.load %arg11[%c16_91, %c32_92] : memref<64x64xf32, #tpu.memory_space<vmem>>, vector<8x32xf32>
    tpu.vector_store %arg11[%c16_91, %c32_92], %240 {strides = array<i32>} : memref<64x64xf32, #tpu.memory_space<vmem>>, vector<8x32xf32>,
    %cst_93 = arith.constant dense<0.000000e+00> : vector<16x256xf32>
    %242 = tpu.matmul %237, %89, %cst_93 {dimension_numbers = #tpu.dot_dimension_numbers<[1], [0], [0], [1], [0, 0, 1, 1], [], []>} : vector<16x32xf32>, vector<32x256xf32>, vector<16x256xf32> -> vector<16x256xf32>
    %c48_94 = arith.constant 48 : index
    %c0_95 = arith.constant 0 : index
    %243 = vector.load %arg10[%c48_94, %c0_95] : memref<64x256xf32, #tpu.memory_space<vmem>>, vector<8x128xf32>
    %244 = vector.extract_strided_slice %242 {offsets = [0, 0], sizes = [8, 128], strides = [1, 1]} : vector<16x256xf32> to vector<8x128xf32>
    %245 = arith.addf %243, %244 : vector<8x128xf32>
    %c8_96 = arith.constant 8 : index
    %c128_97 = arith.constant 128 : index
    %246 = vector.load %arg10[%c8_96, %c128_97] : memref<64x256xf32, #tpu.memory_space<vmem>>, vector<8x128xf32>
    %247 = vector.extract_strided_slice %242 {offsets = [8, 128], sizes = [8, 128], strides = [1, 1]} : vector<16x256xf32> to vector<8x128xf32>
    %248 = arith.addf %246, %247 : vector<8x128xf32>
    %249 = tpu.concatenate %245, %248 in 0 : vector<8x128xf32>, vector<8x128xf32> -> vector<16x128xf32>
    %250 = arith.mulf %249, %8 : vector<16x128xf32>
    %251 = math.tanh %250 : vector<16x128xf32>
    %252 = arith.mulf %251, %8 : vector<16x128xf32>
    %253 = arith.addf %252, %11 : vector<16x128xf32>
    %254 = vector.extract_strided_slice %253 {offsets = [0, 0], sizes = [16, 32], strides = [1, 1]} : vector<16x128xf32> to vector<16x32xf32>
    %255 = vector.extract_strided_slice %253 {offsets = [0, 32], sizes = [16, 32], strides = [1, 1]} : vector<16x128xf32> to vector<16x32xf32>
    %256 = vector.extract_strided_slice %253 {offsets = [0, 64], sizes = [16, 32], strides = [1, 1]} : vector<16x128xf32> to vector<16x32xf32>
    %257 = vector.extract_strided_slice %253 {offsets = [0, 96], sizes = [16, 32], strides = [1, 1]} : vector<16x128xf32> to vector<16x32xf32>
    %258 = arith.mulf %255, %235 : vector<16x32xf32>
    %259 = arith.mulf %254, %256 : vector<16x32xf32>
    %260 = arith.addf %258, %259 : vector<16x32xf32>
    %261 = math.tanh %260 : vector<16x32xf32>
    %262 = arith.mulf %257, %261 : vector<16x32xf32>
    %263 = vector.extract_strided_slice %262 {offsets = [0, 0], sizes = [8, 32], strides = [1, 1]} : vector<16x32xf32> to vector<8x32xf32>
    %c48_98 = arith.constant 48 : index
    %c0_99 = arith.constant 0 : index
    %264 = vector.load %arg11[%c48_98, %c0_99] : memref<64x64xf32, #tpu.memory_space<vmem>>, vector<8x32xf32>
    tpu.vector_store %arg11[%c48_98, %c0_99], %263 {strides = array<i32>} : memref<64x64xf32, #tpu.memory_space<vmem>>, vector<8x32xf32>,
    %265 = vector.extract_strided_slice %262 {offsets = [8, 0], sizes = [8, 32], strides = [1, 1]} : vector<16x32xf32> to vector<8x32xf32>
    %c8_100 = arith.constant 8 : index
    %c32_101 = arith.constant 32 : index
    %266 = vector.load %arg11[%c8_100, %c32_101] : memref<64x64xf32, #tpu.memory_space<vmem>>, vector<8x32xf32>
    tpu.vector_store %arg11[%c8_100, %c32_101], %265 {strides = array<i32>} : memref<64x64xf32, #tpu.memory_space<vmem>>, vector<8x32xf32>,
    %cst_102 = arith.constant dense<0.000000e+00> : vector<16x256xf32>
    %267 = tpu.matmul %262, %89, %cst_102 {dimension_numbers = #tpu.dot_dimension_numbers<[1], [0], [0], [1], [0, 0, 1, 1], [], []>} : vector<16x32xf32>, vector<32x256xf32>, vector<16x256xf32> -> vector<16x256xf32>
    %c56_103 = arith.constant 56 : index
    %c0_104 = arith.constant 0 : index
    %268 = vector.load %arg10[%c56_103, %c0_104] : memref<64x256xf32, #tpu.memory_space<vmem>>, vector<8x128xf32>
    %269 = vector.extract_strided_slice %267 {offsets = [0, 0], sizes = [8, 128], strides = [1, 1]} : vector<16x256xf32> to vector<8x128xf32>
    %270 = arith.addf %268, %269 : vector<8x128xf32>
    %c0_105 = arith.constant 0 : index
    %c128_106 = arith.constant 128 : index
    %271 = vector.load %arg10[%c0_105, %c128_106] : memref<64x256xf32, #tpu.memory_space<vmem>>, vector<8x128xf32>
    %272 = vector.extract_strided_slice %267 {offsets = [8, 128], sizes = [8, 128], strides = [1, 1]} : vector<16x256xf32> to vector<8x128xf32>
    %273 = arith.addf %271, %272 : vector<8x128xf32>
    %274 = tpu.concatenate %270, %273 in 0 : vector<8x128xf32>, vector<8x128xf32> -> vector<16x128xf32>
    %275 = arith.mulf %274, %8 : vector<16x128xf32>
    %276 = math.tanh %275 : vector<16x128xf32>
    %277 = arith.mulf %276, %8 : vector<16x128xf32>
    %278 = arith.addf %277, %11 : vector<16x128xf32>
    %279 = vector.extract_strided_slice %278 {offsets = [0, 0], sizes = [16, 32], strides = [1, 1]} : vector<16x128xf32> to vector<16x32xf32>
    %280 = vector.extract_strided_slice %278 {offsets = [0, 32], sizes = [16, 32], strides = [1, 1]} : vector<16x128xf32> to vector<16x32xf32>
    %281 = vector.extract_strided_slice %278 {offsets = [0, 64], sizes = [16, 32], strides = [1, 1]} : vector<16x128xf32> to vector<16x32xf32>
    %282 = vector.extract_strided_slice %278 {offsets = [0, 96], sizes = [16, 32], strides = [1, 1]} : vector<16x128xf32> to vector<16x32xf32>
    %283 = arith.mulf %280, %260 : vector<16x32xf32>
    %284 = arith.mulf %279, %281 : vector<16x32xf32>
    %285 = arith.addf %283, %284 : vector<16x32xf32>
    %286 = math.tanh %285 : vector<16x32xf32>
    %287 = arith.mulf %282, %286 : vector<16x32xf32>
    %288 = vector.extract_strided_slice %287 {offsets = [0, 0], sizes = [8, 32], strides = [1, 1]} : vector<16x32xf32> to vector<8x32xf32>
    %c56_107 = arith.constant 56 : index
    %c0_108 = arith.constant 0 : index
    %289 = vector.load %arg11[%c56_107, %c0_108] : memref<64x64xf32, #tpu.memory_space<vmem>>, vector<8x32xf32>
    tpu.vector_store %arg11[%c56_107, %c0_108], %288 {strides = array<i32>} : memref<64x64xf32, #tpu.memory_space<vmem>>, vector<8x32xf32>,
    %290 = vector.extract_strided_slice %287 {offsets = [8, 0], sizes = [8, 32], strides = [1, 1]} : vector<16x32xf32> to vector<8x32xf32>
    %c0_109 = arith.constant 0 : index
    %c32_110 = arith.constant 32 : index
    %291 = vector.load %arg11[%c0_109, %c32_110] : memref<64x64xf32, #tpu.memory_space<vmem>>, vector<8x32xf32>
    tpu.vector_store %arg11[%c0_109, %c32_110], %290 {strides = array<i32>} : memref<64x64xf32, #tpu.memory_space<vmem>>, vector<8x32xf32>,
    %c0_111 = arith.constant 0 : index
    %c0_112 = arith.constant 0 : index
    %292 = vector.load %arg11[%c0_111, %c0_112] : memref<64x64xf32, #tpu.memory_space<vmem>>, vector<64x64xf32>
    %c0_113 = arith.constant 0 : index
    %c0_114 = arith.constant 0 : index
    %293 = vector.load %arg4[%c0_113, %c0_114] : memref<64x256xf32, #tpu.memory_space<vmem>>, vector<64x256xf32>
    %cst_115 = arith.constant dense<0.000000e+00> : vector<64x256xf32>
    %294 = tpu.matmul %292, %293, %cst_115 {dimension_numbers = #tpu.dot_dimension_numbers<[1], [0], [0], [1], [0, 0, 1, 1], [], []>} : vector<64x64xf32>, vector<64x256xf32>, vector<64x256xf32> -> vector<64x256xf32>
    %c0_116 = arith.constant 0 : index
    %c0_117 = arith.constant 0 : index
    %295 = vector.load %arg5[%c0_116, %c0_117] : memref<1x256xf32, #tpu.memory_space<vmem>>, vector<1x256xf32>
    %296 = vector.broadcast %295 : vector<1x256xf32> to vector<64x256xf32>
    %297 = arith.addf %294, %296 : vector<64x256xf32>
    %c0_118 = arith.constant 0 : index
    %c0_119 = arith.constant 0 : index
    %298 = vector.load %arg6[%c0_118, %c0_119] : memref<32x128xf32, #tpu.memory_space<vmem>>, vector<32x128xf32>
    %cst_120 = arith.constant 0.000000e+00 : f32
    %299 = vector.broadcast %cst_120 : f32 to vector<8x32xf32>
    %cst_121 = arith.constant 0.000000e+00 : f32
    %300 = vector.broadcast %cst_121 : f32 to vector<8x32xf32>
    %301 = vector.extract_strided_slice %297 {offsets = [0, 0], sizes = [8, 128], strides = [1, 1]} : vector<64x256xf32> to vector<8x128xf32>
    %cst_122 = arith.constant dense<0.000000e+00> : vector<8x128xf32>
    %302 = tpu.matmul %299, %298, %cst_122 {dimension_numbers = #tpu.dot_dimension_numbers<[1], [0], [0], [1], [0, 0, 1, 1], [], []>} : vector<8x32xf32>, vector<32x128xf32>, vector<8x128xf32> -> vector<8x128xf32>
    %303 = arith.addf %301, %302 : vector<8x128xf32>
    %304 = arith.mulf %303, %20 : vector<8x128xf32>
    %305 = math.tanh %304 : vector<8x128xf32>
    %306 = arith.mulf %305, %20 : vector<8x128xf32>
    %307 = arith.addf %306, %23 : vector<8x128xf32>
    %308 = vector.extract_strided_slice %307 {offsets = [0, 0], sizes = [8, 32], strides = [1, 1]} : vector<8x128xf32> to vector<8x32xf32>
    %309 = vector.extract_strided_slice %307 {offsets = [0, 32], sizes = [8, 32], strides = [1, 1]} : vector<8x128xf32> to vector<8x32xf32>
    %310 = vector.extract_strided_slice %307 {offsets = [0, 64], sizes = [8, 32], strides = [1, 1]} : vector<8x128xf32> to vector<8x32xf32>
    %311 = vector.extract_strided_slice %307 {offsets = [0, 96], sizes = [8, 32], strides = [1, 1]} : vector<8x128xf32> to vector<8x32xf32>
    %312 = arith.mulf %309, %300 : vector<8x32xf32>
    %313 = arith.mulf %308, %310 : vector<8x32xf32>
    %314 = arith.addf %312, %313 : vector<8x32xf32>
    %315 = math.tanh %314 : vector<8x32xf32>
    %316 = arith.mulf %311, %315 : vector<8x32xf32>
    %317 = vector.extract_strided_slice %297 {offsets = [8, 0], sizes = [8, 128], strides = [1, 1]} : vector<64x256xf32> to vector<8x128xf32>
    %cst_123 = arith.constant dense<0.000000e+00> : vector<8x128xf32>
    %318 = tpu.matmul %316, %298, %cst_123 {dimension_numbers = #tpu.dot_dimension_numbers<[1], [0], [0], [1], [0, 0, 1, 1], [], []>} : vector<8x32xf32>, vector<32x128xf32>, vector<8x128xf32> -> vector<8x128xf32>
    %319 = arith.addf %317, %318 : vector<8x128xf32>
    %320 = arith.mulf %319, %20 : vector<8x128xf32>
    %321 = math.tanh %320 : vector<8x128xf32>
    %322 = arith.mulf %321, %20 : vector<8x128xf32>
    %323 = arith.addf %322, %23 : vector<8x128xf32>
    %324 = vector.extract_strided_slice %323 {offsets = [0, 0], sizes = [8, 32], strides = [1, 1]} : vector<8x128xf32> to vector<8x32xf32>
    %325 = vector.extract_strided_slice %323 {offsets = [0, 32], sizes = [8, 32], strides = [1, 1]} : vector<8x128xf32> to vector<8x32xf32>
    %326 = vector.extract_strided_slice %323 {offsets = [0, 64], sizes = [8, 32], strides = [1, 1]} : vector<8x128xf32> to vector<8x32xf32>
    %327 = vector.extract_strided_slice %323 {offsets = [0, 96], sizes = [8, 32], strides = [1, 1]} : vector<8x128xf32> to vector<8x32xf32>
    %328 = arith.mulf %325, %314 : vector<8x32xf32>
    %329 = arith.mulf %324, %326 : vector<8x32xf32>
    %330 = arith.addf %328, %329 : vector<8x32xf32>
    %331 = math.tanh %330 : vector<8x32xf32>
    %332 = arith.mulf %327, %331 : vector<8x32xf32>
    %333 = vector.extract_strided_slice %297 {offsets = [16, 0], sizes = [8, 128], strides = [1, 1]} : vector<64x256xf32> to vector<8x128xf32>
    %cst_124 = arith.constant dense<0.000000e+00> : vector<8x128xf32>
    %334 = tpu.matmul %332, %298, %cst_124 {dimension_numbers = #tpu.dot_dimension_numbers<[1], [0], [0], [1], [0, 0, 1, 1], [], []>} : vector<8x32xf32>, vector<32x128xf32>, vector<8x128xf32> -> vector<8x128xf32>
    %335 = arith.addf %333, %334 : vector<8x128xf32>
    %336 = arith.mulf %335, %20 : vector<8x128xf32>
    %337 = math.tanh %336 : vector<8x128xf32>
    %338 = arith.mulf %337, %20 : vector<8x128xf32>
    %339 = arith.addf %338, %23 : vector<8x128xf32>
    %340 = vector.extract_strided_slice %339 {offsets = [0, 0], sizes = [8, 32], strides = [1, 1]} : vector<8x128xf32> to vector<8x32xf32>
    %341 = vector.extract_strided_slice %339 {offsets = [0, 32], sizes = [8, 32], strides = [1, 1]} : vector<8x128xf32> to vector<8x32xf32>
    %342 = vector.extract_strided_slice %339 {offsets = [0, 64], sizes = [8, 32], strides = [1, 1]} : vector<8x128xf32> to vector<8x32xf32>
    %343 = vector.extract_strided_slice %339 {offsets = [0, 96], sizes = [8, 32], strides = [1, 1]} : vector<8x128xf32> to vector<8x32xf32>
    %344 = arith.mulf %341, %330 : vector<8x32xf32>
    %345 = arith.mulf %340, %342 : vector<8x32xf32>
    %346 = arith.addf %344, %345 : vector<8x32xf32>
    %347 = math.tanh %346 : vector<8x32xf32>
    %348 = arith.mulf %343, %347 : vector<8x32xf32>
    %349 = vector.extract_strided_slice %297 {offsets = [24, 0], sizes = [8, 128], strides = [1, 1]} : vector<64x256xf32> to vector<8x128xf32>
    %cst_125 = arith.constant dense<0.000000e+00> : vector<8x128xf32>
    %350 = tpu.matmul %348, %298, %cst_125 {dimension_numbers = #tpu.dot_dimension_numbers<[1], [0], [0], [1], [0, 0, 1, 1], [], []>} : vector<8x32xf32>, vector<32x128xf32>, vector<8x128xf32> -> vector<8x128xf32>
    %351 = arith.addf %349, %350 : vector<8x128xf32>
    %352 = arith.mulf %351, %20 : vector<8x128xf32>
    %353 = math.tanh %352 : vector<8x128xf32>
    %354 = arith.mulf %353, %20 : vector<8x128xf32>
    %355 = arith.addf %354, %23 : vector<8x128xf32>
    %356 = vector.extract_strided_slice %355 {offsets = [0, 0], sizes = [8, 32], strides = [1, 1]} : vector<8x128xf32> to vector<8x32xf32>
    %357 = vector.extract_strided_slice %355 {offsets = [0, 32], sizes = [8, 32], strides = [1, 1]} : vector<8x128xf32> to vector<8x32xf32>
    %358 = vector.extract_strided_slice %355 {offsets = [0, 64], sizes = [8, 32], strides = [1, 1]} : vector<8x128xf32> to vector<8x32xf32>
    %359 = vector.extract_strided_slice %355 {offsets = [0, 96], sizes = [8, 32], strides = [1, 1]} : vector<8x128xf32> to vector<8x32xf32>
    %360 = arith.mulf %357, %346 : vector<8x32xf32>
    %361 = arith.mulf %356, %358 : vector<8x32xf32>
    %362 = arith.addf %360, %361 : vector<8x32xf32>
    %363 = math.tanh %362 : vector<8x32xf32>
    %364 = arith.mulf %359, %363 : vector<8x32xf32>
    %365 = vector.extract_strided_slice %297 {offsets = [32, 0], sizes = [8, 128], strides = [1, 1]} : vector<64x256xf32> to vector<8x128xf32>
    %cst_126 = arith.constant dense<0.000000e+00> : vector<8x128xf32>
    %366 = tpu.matmul %364, %298, %cst_126 {dimension_numbers = #tpu.dot_dimension_numbers<[1], [0], [0], [1], [0, 0, 1, 1], [], []>} : vector<8x32xf32>, vector<32x128xf32>, vector<8x128xf32> -> vector<8x128xf32>
    %367 = arith.addf %365, %366 : vector<8x128xf32>
    %368 = arith.mulf %367, %20 : vector<8x128xf32>
    %369 = math.tanh %368 : vector<8x128xf32>
    %370 = arith.mulf %369, %20 : vector<8x128xf32>
    %371 = arith.addf %370, %23 : vector<8x128xf32>
    %372 = vector.extract_strided_slice %371 {offsets = [0, 0], sizes = [8, 32], strides = [1, 1]} : vector<8x128xf32> to vector<8x32xf32>
    %373 = vector.extract_strided_slice %371 {offsets = [0, 32], sizes = [8, 32], strides = [1, 1]} : vector<8x128xf32> to vector<8x32xf32>
    %374 = vector.extract_strided_slice %371 {offsets = [0, 64], sizes = [8, 32], strides = [1, 1]} : vector<8x128xf32> to vector<8x32xf32>
    %375 = vector.extract_strided_slice %371 {offsets = [0, 96], sizes = [8, 32], strides = [1, 1]} : vector<8x128xf32> to vector<8x32xf32>
    %376 = arith.mulf %373, %362 : vector<8x32xf32>
    %377 = arith.mulf %372, %374 : vector<8x32xf32>
    %378 = arith.addf %376, %377 : vector<8x32xf32>
    %379 = math.tanh %378 : vector<8x32xf32>
    %380 = arith.mulf %375, %379 : vector<8x32xf32>
    %381 = vector.extract_strided_slice %297 {offsets = [40, 0], sizes = [8, 128], strides = [1, 1]} : vector<64x256xf32> to vector<8x128xf32>
    %cst_127 = arith.constant dense<0.000000e+00> : vector<8x128xf32>
    %382 = tpu.matmul %380, %298, %cst_127 {dimension_numbers = #tpu.dot_dimension_numbers<[1], [0], [0], [1], [0, 0, 1, 1], [], []>} : vector<8x32xf32>, vector<32x128xf32>, vector<8x128xf32> -> vector<8x128xf32>
    %383 = arith.addf %381, %382 : vector<8x128xf32>
    %384 = arith.mulf %383, %20 : vector<8x128xf32>
    %385 = math.tanh %384 : vector<8x128xf32>
    %386 = arith.mulf %385, %20 : vector<8x128xf32>
    %387 = arith.addf %386, %23 : vector<8x128xf32>
    %388 = vector.extract_strided_slice %387 {offsets = [0, 0], sizes = [8, 32], strides = [1, 1]} : vector<8x128xf32> to vector<8x32xf32>
    %389 = vector.extract_strided_slice %387 {offsets = [0, 32], sizes = [8, 32], strides = [1, 1]} : vector<8x128xf32> to vector<8x32xf32>
    %390 = vector.extract_strided_slice %387 {offsets = [0, 64], sizes = [8, 32], strides = [1, 1]} : vector<8x128xf32> to vector<8x32xf32>
    %391 = vector.extract_strided_slice %387 {offsets = [0, 96], sizes = [8, 32], strides = [1, 1]} : vector<8x128xf32> to vector<8x32xf32>
    %392 = arith.mulf %389, %378 : vector<8x32xf32>
    %393 = arith.mulf %388, %390 : vector<8x32xf32>
    %394 = arith.addf %392, %393 : vector<8x32xf32>
    %395 = math.tanh %394 : vector<8x32xf32>
    %396 = arith.mulf %391, %395 : vector<8x32xf32>
    %397 = vector.extract_strided_slice %297 {offsets = [48, 0], sizes = [8, 128], strides = [1, 1]} : vector<64x256xf32> to vector<8x128xf32>
    %cst_128 = arith.constant dense<0.000000e+00> : vector<8x128xf32>
    %398 = tpu.matmul %396, %298, %cst_128 {dimension_numbers = #tpu.dot_dimension_numbers<[1], [0], [0], [1], [0, 0, 1, 1], [], []>} : vector<8x32xf32>, vector<32x128xf32>, vector<8x128xf32> -> vector<8x128xf32>
    %399 = arith.addf %397, %398 : vector<8x128xf32>
    %400 = arith.mulf %399, %20 : vector<8x128xf32>
    %401 = math.tanh %400 : vector<8x128xf32>
    %402 = arith.mulf %401, %20 : vector<8x128xf32>
    %403 = arith.addf %402, %23 : vector<8x128xf32>
    %404 = vector.extract_strided_slice %403 {offsets = [0, 0], sizes = [8, 32], strides = [1, 1]} : vector<8x128xf32> to vector<8x32xf32>
    %405 = vector.extract_strided_slice %403 {offsets = [0, 32], sizes = [8, 32], strides = [1, 1]} : vector<8x128xf32> to vector<8x32xf32>
    %406 = vector.extract_strided_slice %403 {offsets = [0, 64], sizes = [8, 32], strides = [1, 1]} : vector<8x128xf32> to vector<8x32xf32>
    %407 = vector.extract_strided_slice %403 {offsets = [0, 96], sizes = [8, 32], strides = [1, 1]} : vector<8x128xf32> to vector<8x32xf32>
    %408 = arith.mulf %405, %394 : vector<8x32xf32>
    %409 = arith.mulf %404, %406 : vector<8x32xf32>
    %410 = arith.addf %408, %409 : vector<8x32xf32>
    %411 = math.tanh %410 : vector<8x32xf32>
    %412 = arith.mulf %407, %411 : vector<8x32xf32>
    %413 = vector.extract_strided_slice %297 {offsets = [56, 0], sizes = [8, 128], strides = [1, 1]} : vector<64x256xf32> to vector<8x128xf32>
    %cst_129 = arith.constant dense<0.000000e+00> : vector<8x128xf32>
    %414 = tpu.matmul %412, %298, %cst_129 {dimension_numbers = #tpu.dot_dimension_numbers<[1], [0], [0], [1], [0, 0, 1, 1], [], []>} : vector<8x32xf32>, vector<32x128xf32>, vector<8x128xf32> -> vector<8x128xf32>
    %415 = arith.addf %413, %414 : vector<8x128xf32>
    %416 = arith.mulf %415, %20 : vector<8x128xf32>
    %417 = math.tanh %416 : vector<8x128xf32>
    %418 = arith.mulf %417, %20 : vector<8x128xf32>
    %419 = arith.addf %418, %23 : vector<8x128xf32>
    %420 = vector.extract_strided_slice %419 {offsets = [0, 0], sizes = [8, 32], strides = [1, 1]} : vector<8x128xf32> to vector<8x32xf32>
    %421 = vector.extract_strided_slice %419 {offsets = [0, 32], sizes = [8, 32], strides = [1, 1]} : vector<8x128xf32> to vector<8x32xf32>
    %422 = vector.extract_strided_slice %419 {offsets = [0, 64], sizes = [8, 32], strides = [1, 1]} : vector<8x128xf32> to vector<8x32xf32>
    %423 = vector.extract_strided_slice %419 {offsets = [0, 96], sizes = [8, 32], strides = [1, 1]} : vector<8x128xf32> to vector<8x32xf32>
    %424 = arith.mulf %421, %410 : vector<8x32xf32>
    %425 = arith.mulf %420, %422 : vector<8x32xf32>
    %426 = arith.addf %424, %425 : vector<8x32xf32>
    %427 = math.tanh %426 : vector<8x32xf32>
    %428 = arith.mulf %423, %427 : vector<8x32xf32>
    %429 = vector.extract_strided_slice %297 {offsets = [56, 128], sizes = [8, 128], strides = [1, 1]} : vector<64x256xf32> to vector<8x128xf32>
    %cst_130 = arith.constant 0.000000e+00 : f32
    %430 = vector.broadcast %cst_130 : f32 to vector<8x32xf32>
    %431 = arith.mulf %429, %20 : vector<8x128xf32>
    %432 = math.tanh %431 : vector<8x128xf32>
    %433 = arith.mulf %432, %20 : vector<8x128xf32>
    %434 = arith.addf %433, %23 : vector<8x128xf32>
    %435 = vector.extract_strided_slice %434 {offsets = [0, 0], sizes = [8, 32], strides = [1, 1]} : vector<8x128xf32> to vector<8x32xf32>
    %436 = vector.extract_strided_slice %434 {offsets = [0, 32], sizes = [8, 32], strides = [1, 1]} : vector<8x128xf32> to vector<8x32xf32>
    %437 = vector.extract_strided_slice %434 {offsets = [0, 64], sizes = [8, 32], strides = [1, 1]} : vector<8x128xf32> to vector<8x32xf32>
    %438 = vector.extract_strided_slice %434 {offsets = [0, 96], sizes = [8, 32], strides = [1, 1]} : vector<8x128xf32> to vector<8x32xf32>
    %439 = arith.mulf %436, %430 : vector<8x32xf32>
    %440 = arith.mulf %435, %437 : vector<8x32xf32>
    %441 = arith.addf %439, %440 : vector<8x32xf32>
    %442 = math.tanh %441 : vector<8x32xf32>
    %443 = arith.mulf %438, %442 : vector<8x32xf32>
    %444 = tpu.concatenate %428, %443 in 1 : vector<8x32xf32>, vector<8x32xf32> -> vector<8x64xf32>
    %c0_131 = arith.constant 0 : index
    %c0_132 = arith.constant 0 : index
    %445 = vector.load %arg7[%c0_131, %c0_132] : memref<64x128xf32, #tpu.memory_space<vmem>>, vector<64x128xf32>
    %cst_133 = arith.constant dense<0.000000e+00> : vector<8x128xf32>
    %446 = tpu.matmul %444, %445, %cst_133 {dimension_numbers = #tpu.dot_dimension_numbers<[1], [0], [0], [1], [0, 0, 1, 1], [], []>} : vector<8x64xf32>, vector<64x128xf32>, vector<8x128xf32> -> vector<8x128xf32>
    %c0_134 = arith.constant 0 : index
    %c0_135 = arith.constant 0 : index
    %447 = vector.load %arg8[%c0_134, %c0_135] : memref<1x128xf32, #tpu.memory_space<vmem>>, vector<1x128xf32>
    %448 = vector.broadcast %447 : vector<1x128xf32> to vector<8x128xf32>
    %449 = arith.addf %446, %448 : vector<8x128xf32>
    %c0_136 = arith.constant 0 : index
    %c0_137 = arith.constant 0 : index
    %450 = vector.load %arg9[%c0_136, %c0_137] : memref<8x128xf32, #tpu.memory_space<vmem>>, vector<8x128xf32>
    tpu.vector_store %arg9[%c0_136, %c0_137], %449 {strides = array<i32>} : memref<8x128xf32, #tpu.memory_space<vmem>>, vector<8x128xf32>,
    return
  }
  func.func @transform_0(%arg0: i32, %arg1: memref<16xi32, #tpu.memory_space<smem>>) -> (i32, i32) {
    %c0_i32 = arith.constant 0 : i32
    %c0_i32_0 = arith.constant 0 : i32
    %c0_i32_1 = arith.constant 0 : i32
    return %c0_i32, %c0_i32_0 : i32, i32
  }
  func.func @transform_1(%arg0: i32, %arg1: memref<16xi32, #tpu.memory_space<smem>>) -> (i32, i32) {
    %c0_i32 = arith.constant 0 : i32
    %c0_i32_0 = arith.constant 0 : i32
    %c0_i32_1 = arith.constant 0 : i32
    return %c0_i32, %c0_i32_0 : i32, i32
  }
  func.func @transform_2(%arg0: i32, %arg1: memref<16xi32, #tpu.memory_space<smem>>) -> (i32, i32) {
    %c0_i32 = arith.constant 0 : i32
    %c0_i32_0 = arith.constant 0 : i32
    %c0_i32_1 = arith.constant 0 : i32
    return %c0_i32, %c0_i32_0 : i32, i32
  }
  func.func @transform_3(%arg0: i32, %arg1: memref<16xi32, #tpu.memory_space<smem>>) -> (i32, i32) {
    %c0_i32 = arith.constant 0 : i32
    %c0_i32_0 = arith.constant 0 : i32
    %c0_i32_1 = arith.constant 0 : i32
    return %c0_i32, %c0_i32_0 : i32, i32
  }
  func.func @transform_4(%arg0: i32, %arg1: memref<16xi32, #tpu.memory_space<smem>>) -> (i32, i32) {
    %c0_i32 = arith.constant 0 : i32
    %c0_i32_0 = arith.constant 0 : i32
    %c0_i32_1 = arith.constant 0 : i32
    return %c0_i32, %c0_i32_0 : i32, i32
  }
  func.func @transform_5(%arg0: i32, %arg1: memref<16xi32, #tpu.memory_space<smem>>) -> (i32, i32) {
    %c0_i32 = arith.constant 0 : i32
    %c0_i32_0 = arith.constant 0 : i32
    %c0_i32_1 = arith.constant 0 : i32
    return %c0_i32, %c0_i32_0 : i32, i32
  }
  func.func @transform_6(%arg0: i32, %arg1: memref<16xi32, #tpu.memory_space<smem>>) -> (i32, i32) {
    %c0_i32 = arith.constant 0 : i32
    %c0_i32_0 = arith.constant 0 : i32
    %c0_i32_1 = arith.constant 0 : i32
    return %c0_i32, %c0_i32_0 : i32, i32
  }
  func.func @transform_7(%arg0: i32, %arg1: memref<16xi32, #tpu.memory_space<smem>>) -> (i32, i32) {
    %c0_i32 = arith.constant 0 : i32
    %c0_i32_0 = arith.constant 0 : i32
    %c0_i32_1 = arith.constant 0 : i32
    return %c0_i32, %c0_i32_0 : i32, i32
  }
}

</mosaic_0001>

<bundles_post_ra>
// kernel: tpu_custom_call.1
= control target key start
LH: loop header
LB: loop body
LE: loop exit
PB: predicated region body
PF: predicated region fallthrough
CT: control target
= control target key end

     0   :  { %s4173_s0 = inlined_call_operand.hbm [shape: s32[16], index: 0, kind: input, shape index: {}]   ;;  %s4174_s1 = inlined_call_operand.hbm [shape: f32[50,256], index: 1, kind: input, shape index: {}]   ;;  %s4175_s2 = inlined_call_operand.hbm [shape: f32[32,256], index: 2, kind: input, shape index: {}]   ;;  %s4176_s3 = inlined_call_operand.hbm [shape: f32[64,256], index: 3, kind: input, shape index: {}]   ;;  %s4177_s4 = inlined_call_operand.vmem [shape: f32[1,256], index: 4, kind: input, shape index: {}]   ;;  %s4178_s5 = inlined_call_operand.hbm [shape: f32[32,128], index: 5, kind: input, shape index: {}]   ;;  %s4179_s6 = inlined_call_operand.hbm [shape: f32[64,128], index: 6, kind: input, shape index: {}]   ;;  %s4180_s7 = inlined_call_operand.vmem [shape: f32[1,128], index: 7, kind: input, shape index: {}]   ;;  %s4181_s8 = inlined_call_operand.hbm [shape: f32[8,128], index: 8, kind: output, shape index: {}]  }
   0x1   :  { %s3247_s29 = scalar_lea.hbm %s4173_s0, 16 }
   0x2   :  { %p3248_p0 = scmp.ne.s32.totalorder %s4173_s0, %s3247_s29  ;;  %p3251_p1 = scmp.lt.u32.totalorder %s3247_s29, %s4173_s0 }
   0x4   :  { %p3253_p2 = pnand %p3251_p1, %p3248_p0 }
   0x6   :  { %3256 = shalt.err (!%p3253_p2)  }
   0x7   :  { %s3399_s12 = smov [#allocation5]  }
   0x8   :  { %14 = dma.hbm_to_smem %s4173_s0, 16, %s3399_s12, [#allocation4] }
   0x9   :  { %3389 = dma.done.wait [#allocation4], 16 }
   0xa   :  { %3390 = vsyncadd [#allocation4], 4294967280 }
   0xb   :  { %16 = sfence }
   0xc   :  { %17 = vsyncpa [#allocation7], 0 }
   0xd   :  { %18 = vsyncpa [#allocation10], 0 }
   0xe   :  { %19 = vsyncpa [#allocation13], 0 }
   0xf   :  { %20 = vsyncpa [#allocation8], 0  ;;  %s3400_s15 = smov [#allocation9]   ;;  %s3401_s17 = smov [#allocation12]  }
  0x10   :  { %s38_s16 = sshll.u32 %s3400_s15, 4  ;;  %s64_s18 = sshll.u32 %s3401_s17, 4  ;;  %s39_s16 = int_to_ptr.vmem [resolvable:$true] %s38_s16  ;;  %s3473_s18 = int_to_ptr.vmem [resolvable:$true] %s64_s18 }
  0x11   :  { %s3257_s21 = scalar_lea.hbm %s4175_s2, 1024 }
  0x12   :  { %p3258_p3 = scmp.ne.s32.totalorder %s4175_s2, %s3257_s21  ;;  %p3261_p4 = scmp.lt.u32.totalorder %s3257_s21, %s4175_s2 }
  0x14   :  { %p3263_p5 = pnand %p3261_p4, %p3258_p3 }
  0x16   :  { %3266 = shalt.err (!%p3263_p5)
}
  0x17   :  { %s3267_s25 = scalar_lea.vmem %s39_s16, 1024  ;;  %p3272_p7 = scmp.lt.s32.totalorder %s39_s16, %s39_s16 }
  0x18   :  { %p3268_p6 = scmp.ne.s32.totalorder %s39_s16, %s3267_s25  ;;  %p3273_p8 = scmp.lt.s32.totalorder %s3267_s25, %s3267_s25 }
  0x1a   :  { %p3274_p9 = por %p3273_p8, %p3272_p7 }
  0x1c   :  { %p3275_p10 = pnand %p3274_p9, %p3268_p6 }
  0x1e   :  { %3278 = shalt.err (!%p3275_p10)
}
  0x1f   :  { %s3402_s26 = smov 256   ;;  %s3403_s27 = smov 16  }
  0x20   :  { %44 = dma.hbm_to_vmem [thread:$0]  %s4175_s2, 1024, %s39_s16, [#allocation10], %s3402_s26, %s3402_s26, %s3403_s27  }
  0x21   :  { %s3279_s10 = scalar_lea.hbm %s4178_s5, 512 }
  0x22   :  { %p3280_p11 = scmp.ne.s32.totalorder %s4178_s5, %s3279_s10  ;;  %p3283_p12 = scmp.lt.u32.totalorder %s3279_s10, %s4178_s5 }
  0x24   :  { %p3285_p13 = pnand %p3283_p12, %p3280_p11 }
  0x26   :  { %3288 = shalt.err (!%p3285_p13)
}
  0x27   :  { %s3289_s15 = scalar_lea.vmem %s3473_s18, 512  ;;  %p3294_p1 = scmp.lt.s32.totalorder %s3473_s18, %s3473_s18 }
  0x28   :  { %p3290_p0 = scmp.ne.s32.totalorder %s3473_s18, %s3289_s15  ;;  %p3295_p2 = scmp.lt.s32.totalorder %s3289_s15, %s3289_s15 }
  0x2a   :  { %p3296_p3 = por %p3295_p2, %p3294_p1 }
  0x2c   :  { %p3297_p4 = pnand %p3296_p3, %p3290_p0 }
  0x2e   :  { %3300 = shalt.err (!%p3297_p4)
}
  0x2f   :  { %s3404_s2 = smov 128   ;;  %s3405_s16 = smov 8  }
  0x30   :  { %70 = dma.hbm_to_vmem [thread:$0]  %s4178_s5, 512, %s3473_s18, [#allocation13], %s3404_s2, %s3404_s2, %s3405_s16  }
  0x31   :  { %s3406_s20 = smov [#allocation6]   ;;  %s3407_s22 = smov [#allocation11]  }
  0x32   :  { %s26_s21 = sshll.u32 %s3406_s20, 4  ;;  %s50_s0 = sshll.u32 %s3407_s22, 4  ;;  %s27_s21 = int_to_ptr.vmem [resolvable:$true] %s26_s21  ;;  %s3510_s0 = int_to_ptr.vmem [resolvable:$true] %s50_s0 }
  0x33   :  { %s3301_s25 = scalar_lea.hbm %s4174_s1, 1792 }
  0x34   :  { %p3302_p5 = scmp.ne.s32.totalorder %s4174_s1, %s3301_s25  ;;  %p3305_p6 = scmp.lt.u32.totalorder %s3301_s25, %s4174_s1 }
  0x36   :  { %p3307_p7 = pnand %p3305_p6, %p3302_p5 }
  0x38   :  { %3310 = shalt.err (!%p3307_p7)
}
  0x39   :  { %s3311_s5 = scalar_lea.vmem %s27_s21, 1792  ;;  %p3316_p9 = scmp.lt.s32.totalorder %s27_s21, %s27_s21 }
  0x3a   :  { %p3312_p8 = scmp.ne.s32.totalorder %s27_s21, %s3311_s5  ;;  %p3317_p10 = scmp.lt.s32.totalorder %s3311_s5, %s3311_s5 }
  0x3c   :  { %p3318_p11 = por %p3317_p10, %p3316_p9 }
  0x3e   :  { %p3319_p12 = pnand %p3318_p11, %p3312_p8 }
  0x40   :  { %3322 = shalt.err (!%p3319_p12)
}
  0x41   :  { %32 = dma.hbm_to_vmem [thread:$0]  %s4174_s1, 1792, %s27_s21, [#allocation7], %s3402_s26, %s3402_s26, %s3403_s27  }
  0x42   :  { %s3323_s13 = scalar_lea.hbm %s4176_s3, 2048 }
  0x43   :  { %p3324_p13 = scmp.ne.s32.totalorder %s4176_s3, %s3323_s13  ;;  %p3327_p0 = scmp.lt.u32.totalorder %s3323_s13, %s4176_s3 }
  0x45   :  { %p3329_p1 = pnand %p3327_p0, %p3324_p13 }
  0x47   :  { %3332 = shalt.err (!%p3329_p1)
}
  0x48   :  { %s3333_s20 = scalar_lea.vmem %s3510_s0, 2048  ;;  %p3338_p3 = scmp.lt.s32.totalorder %s3510_s0, %s3510_s0 }
  0x49   :  { %p3334_p2 = scmp.ne.s32.totalorder %s3510_s0, %s3333_s20  ;;  %p3339_p4 = scmp.lt.s32.totalorder %s3333_s20, %s3333_s20 }
  0x4b   :  { %p3340_p5 = por %p3339_p4, %p3338_p3 }
  0x4d   :  { %p3341_p6 = pnand %p3340_p5, %p3334_p2 }
  0x4f   :  { %3344 = shalt.err (!%p3341_p6)
}
  0x50   :  { %56 = dma.hbm_to_vmem [thread:$0]  %s4176_s3, 2048, %s3510_s0, [#allocation10], %s3402_s26, %s3402_s26, %s3403_s27  }
  0x51   :  { %s3408_s22 = smov [#allocation14]   ;;  %s3345_s28 = scalar_lea.hbm %s4179_s6, 1024 }
  0x52   :  { %s76_s23 = sshll.u32 %s3408_s22, 4  ;;  %p3346_p7 = scmp.ne.s32.totalorder %s4179_s6, %s3345_s28  ;;  %s77_s23 = int_to_ptr.vmem [resolvable:$true] %s76_s23 }
  0x53   :  { %p3349_p8 = scmp.lt.u32.totalorder %s3345_s28, %s4179_s6 }
  0x55   :  { %p3351_p9 = pnand %p3349_p8, %p3346_p7 }
  0x57   :  { %3354 = shalt.err (!%p3351_p9)
}
  0x58   :  { %s3355_s18 = scalar_lea.vmem %s77_s23, 1024  ;;  %p3360_p11 = scmp.lt.s32.totalorder %s77_s23, %s77_s23 }
  0x59   :  { %p3356_p10 = scmp.ne.s32.totalorder %s77_s23, %s3355_s18  ;;  %p3361_p12 = scmp.lt.s32.totalorder %s3355_s18, %s3355_s18 }
  0x5b   :  { %p3362_p13 = por %p3361_p12, %p3360_p11 }
  0x5d   :  { %p3363_p0 = pnand %p3362_p13, %p3356_p10 }
  0x5f   :  { %3366 = shalt.err (!%p3363_p0)
}
  0x60   :  { %82 = dma.hbm_to_vmem [thread:$0]  %s4179_s6, 1024, %s77_s23, [#allocation13], %s3404_s2, %s3404_s2, %s3405_s16  }
  0x61   :  { %3391 = dma.done.wait [#allocation7], 1792  }
  0x62   :  { %3392 = vsyncadd [#allocation7], 4294965504 }
  0x63   :  { %3393 = dma.done.wait [#allocation10], 3072  }
  0x64   :  { %3394 = vsyncadd [#allocation10], 4294964224 }
  0x65   :  { %3395 = dma.done.wait [#allocation13], 1536  }
  0x66   :  { %3396 = vsyncadd [#allocation13], 4294965760  ;;  %v3409_v0 = vmov 0.0   ;;  %v494_v1 = vld [vmem:[#allocation9 + $0x8] sm:$0xff]  ;;  %v496_v2 = vld [vmem:[#allocation9 + $0x18] sm:$0xff]  ;;  %s107_s6 = sld [smem:[#allocation5]]  ;;  %v100_v13 = vlaneseq }
  0x67   :  { %569 = vmatprep.mubr.f32.mxu0 %v3409_v0  ;;  %707 = vmatprep.mubr.f32.mxu1 %v3409_v0  ;;  %v493_v3 = vld [vmem:[#allocation9] sm:$0xff]  ;;  %v3564_v4 = vpack.c.bf16 %v496_v2, %v494_v1  ;;  %v495_v5 = vld [vmem:[#allocation9 + $0x10] sm:$0xff]  ;;  %v498_v6 = vld [vmem:[#allocation9 + $0x28] sm:$0xff]  ;;  %s2724_s27 = sld [smem:[#allocation5 + $0x8]]  ;;  %s2763_s2 = sld [smem:[#allocation5 + $0x7]]  ;;  %vm149_vm0 = vcmask 1040384  }
  0x68   :  { %v500_v7 = vld [vmem:[#allocation9 + $0x38] sm:$0xff]  ;;  %v3566_v8 = vpack.c.bf16 %v495_v5, %v493_v3  ;;  %v497_v10 = vld [vmem:[#allocation9 + $0x20] sm:$0xff]  ;;  %v499_v11 = vld [vmem:[#allocation9 + $0x30] sm:$0xff]  ;;  %s2766_s16 = sld [smem:[#allocation5 + $0xf]]  ;;  %v129_v14 = vshrl.u32 %v100_v13, 7  ;;  %v101_v18 = vand.u32 127, %v100_v13 }
  0x69   :  { %v3568_v9 = vpack.c.bf16 %v500_v7, %v498_v6  ;;  %2973 = vmatprep.subr.bf16.mxu0 %v3564_v4  ;;  %2981 = vmatprep.subr.bf16.mxu1 %v3564_v4  ;;  %v3573_v12 = vpack.c.bf16 %v499_v11, %v497_v10  ;;  %vm152_vm3 = vcmask 1041408   ;;  %v3410_v29 = vmov 0.5   ;;  %s3411_s5 = smov 64   ;;  %s3412_s18 = smov 32  }
  0x6a   :  { %2975 = vmatpush1.bf16.msra.mxu0 %v3566_v8  ;;  %2983 = vmatpush1.bf16.msra.mxu1 %v3566_v8  ;;  %v3594_v15 = vsub.s32 0, %v129_v14  ;;  %v3608_v21 = vsub.s32 1, %v129_v14  ;;  %vm102_vm1 = vcmp.ge.s32.totalorder %v101_v18, 64  ;;  %vm103_vm2 = vcmp.lt.s32.totalorder %v101_v18, 96  ;;  %s2727_s3 = sld [smem:[#allocation5 + $0x1]] }
  0x6b   :  { %2977 = vmatprep.subr.bf16.mxu0 %v3568_v9  ;;  %2985 = vmatprep.subr.bf16.mxu1 %v3568_v9  ;;  %vm3619_vm4 = vmand %vm102_vm1, %vm103_vm2  ;;  %vm501_vm5 = vcmask 261120   ;;  %s2730_s26 = sld [smem:[#allocation5 + $0x9]]  ;;  %vm3414_vm6 = vmmov 0   ;;  %vm635_vm7 = vcmask 523520   ;;  %vm1632_vm8 = vcmask 523264  }
  0x6c   :  { %s108_s0 = sshra.s32 %s107_s6, 3  ;;  %s111_s11 = sand.u32 7, %s107_s6  ;;  %v3626_v30 = vsel %vm3619_vm4, 1.0, %v3410_v29  ;;  %v3634_v42 = vsel %vm3619_vm4, 0.0, %v3410_v29 }
  0x6d   :  { %s118_s10 = sshra.s32 %s2724_s27, 3  ;;  %s2800_s12 = sshll.u32 %s108_s0, 4 }
  0x6e   :  { %2979 = vmatpush1.bf16.msra.mxu0 %v3573_v12  ;;  %2987 = vmatpush1.bf16.msra.mxu1 %v3573_v12  ;;  %s121_s13 = sand.u32 7, %s2724_s27  ;;  %s2801_s14 = sshll.u32 %s118_s10, 4 }
  0x6f   :  { %2989 = vmatprep.subr.bf16.mxu0 %v3564_v4  ;;  %2997 = vmatprep.subr.bf16.mxu1 %v3564_v4  ;;  %s446_s15 = sshra.s32 %s2763_s2, 3  ;;  %s456_s17 = sshra.s32 %s2766_s16, 3 }
  0x70   :  { %s3590_s19 = sadd.s32 %s2800_s12, %s111_s11  ;;  %s3592_s20 = sadd.s32 %s2801_s14, %s121_s13 }
  0x71   :  { %570 = vmatmul.mubr.f32.vlgmr.msra.gmra.mrb[0].mxu0 %v3409_v0  ;;  %s449_s1 = sand.u32 7, %s2763_s2  ;;  %s2814_s21 = sshll.u32 %s446_s15, 4 }
  0x72   :  { %574 = vmatprep.mubr.f32.mxu0 %v3409_v0  ;;  %2991 = vmatpush1.bf16.msra.mxu0 %v3566_v8  ;;  %s459_s22 = sand.u32 7, %s2766_s16  ;;  %s2815_s23 = sshll.u32 %s456_s17, 4 }
  0x73   :  { %2993 = vmatprep.subr.bf16.mxu0 %v3568_v9  ;;  %s3596_s24 = sadd.s32 %s2814_s21, %s449_s1  ;;  %s3598_s25 = sadd.s32 %s2815_s23, %s459_s22 }
  0x74   :  { %s4185_s28 = scalar_lea.vmem [#allocation6], %s3590_s19  ;;  %s4184_s29 = scalar_lea.vmem [#allocation6], %s3592_s20 }
  0x75   :  { %575 = vmatmul.mubr.f32.gmra.mrb[2].mxu0 %v3409_v0  ;;  %v116_v16 = vld [vmem:[%s4185_s28] ss:$8 sm:$0x3]  ;;  %s4183_s30 = scalar_lea.vmem [#allocation6], %s3596_s24  ;;  %s4182_s9 = scalar_lea.vmem [#allocation6], %s3598_s25 }
  0x76   :  { %2995 = vmatpush1.bf16.msra.mxu0 %v3573_v12  ;;  %844 = vmatprep.mubr.f32.mxu0 %v3409_v0  ;;  %v126_v17 = vld [vmem:[%s4184_s29] ss:$8 sm:$0x3]  ;;  %v131_v19 = vrot.slane %v116_v16, %v3594_v15  ;;  %s158_s6 = sshra.s32 %s2727_s3, 3  ;;  %s2757_s27 = sld [smem:[#allocation5 + $0x6]] }
  0x77   :  { %3005 = vmatprep.subr.bf16.mxu0 %v3564_v4  ;;  %v142_v20 = vrot.slane %v126_v17, %v3594_v15  ;;  %v454_v22 = vld [vmem:[%s4183_s30] ss:$8 sm:$0x3]  ;;  %s168_s2 = sshra.s32 %s2730_s26, 3  ;;  %s2760_s16 = sld [smem:[#allocation5 + $0xe]] }
  0x78   :  { %v464_v23 = vld [vmem:[%s4182_s9] ss:$8 sm:$0x3]  ;;  %v473_v25 = vrot.slane %v454_v22, %v3608_v21  ;;  %s161_s0 = sand.u32 7, %s2727_s3  ;;  %s2802_s10 = sshll.u32 %s158_s6, 4 }
  0x79   :  { %v150_v24 = vsel %vm149_vm0, %v131_v19, %v142_v20  ;;  %v484_v26 = vrot.slane %v464_v23, %v3608_v21  ;;  %s171_s11 = sand.u32 7, %s2730_s26  ;;  %s2803_s12 = sshll.u32 %s168_s2, 4 }
  0x7a   :  { %v153_v28 = vsel %vm152_vm3, %v150_v24, 0.0  ;;  %s164_s13 = sadd.s32 %s2802_s10, %s161_s0  ;;  %s174_s14 = sadd.s32 %s2803_s12, %s171_s11 }
  0x7b   :  { %v488_v32 = vsel %vm149_vm0, %v473_v25, %v484_v26  ;;  %s165_s9 = scalar_lea.vmem [#allocation6], %s164_s13  ;;  %s175_s30 = scalar_lea.vmem [#allocation6], %s174_s14 }
  0x7c   :  { %v490_v36 = vsel %vm152_vm3, %v488_v32, 0.0  ;;  %s398_s15 = sshra.s32 %s2757_s27, 3  ;;  %s401_s1 = sand.u32 7, %s2757_s27  ;;  %v3666_v3 = vld [vmem:[%s165_s9] ss:$8 sm:$0x3] }
  0x7d   :  { %s408_s17 = sshra.s32 %s2760_s16, 3  ;;  %s2812_s21 = sshll.u32 %s398_s15, 4  ;;  %v3668_v5 = vld [vmem:[%s175_s30] ss:$8 sm:$0x3]  ;;  %v181_v6 = vrot.slane %v3666_v3, %v3594_v15 }
  0x7e   :  { %s411_s22 = sand.u32 7, %s2760_s16  ;;  %s2813_s23 = sshll.u32 %s408_s17, 4  ;;  %v192_v7 = vrot.slane %v3668_v5, %v3594_v15 }
  0x7f   :  { %s404_s29 = sadd.s32 %s2812_s21, %s401_s1  ;;  %s414_s28 = sadd.s32 %s2813_s23, %s411_s22 }
  0x80   :  { %s405_s3 = scalar_lea.vmem [#allocation6], %s404_s29  ;;  %s415_s26 = scalar_lea.vmem [#allocation6], %s414_s28  ;;  %v199_v13 = vsel %vm149_vm0, %v181_v6, %v192_v7 }
  0x81   :  { %v3674_v10 = vld [vmem:[%s405_s3] ss:$8 sm:$0x3]  ;;  %v201_v17 = vsel %vm152_vm3, %v199_v13, 0.0  ;;  %s2733_s28 = sld [smem:[#allocation5 + $0x2]]  ;;  %s2751_s9 = sld [smem:[#allocation5 + $0x5]] }
  0x82   :  { %v3676_v11 = vld [vmem:[%s415_s26] ss:$8 sm:$0x3]  ;;  %v425_v14 = vrot.slane %v3674_v10, %v3608_v21  ;;  %s2736_s29 = sld [smem:[#allocation5 + $0xa]]  ;;  %s2754_s27 = sld [smem:[#allocation5 + $0xd]] }
  0x83   :  { %v436_v16 = vrot.slane %v3676_v11, %v3608_v21 }
  0x85   :  { %v440_v22 = vsel %vm149_vm0, %v425_v14, %v436_v16 }
  0x86   :  { %v442_v24 = vsel %vm152_vm3, %v440_v22, 0.0 }
  0x87   :  { %s206_s30 = sshra.s32 %s2733_s28, 3  ;;  %s209_s2 = sand.u32 7, %s2733_s28 }
  0x88   :  { %s216_s6 = sshra.s32 %s2736_s29, 3  ;;  %s2804_s16 = sshll.u32 %s206_s30, 4 }
  0x89   :  { %s219_s0 = sand.u32 7, %s2736_s29  ;;  %s2805_s10 = sshll.u32 %s216_s6, 4 }
  0x8a   :  { %s212_s11 = sadd.s32 %s2804_s16, %s209_s2  ;;  %s222_s12 = sadd.s32 %s2805_s10, %s219_s0 }
  0x8b   :  { %s350_s13 = sshra.s32 %s2751_s9, 3  ;;  %s360_s14 = sshra.s32 %s2754_s27, 3 }
  0x8c   :  { %s353_s15 = sand.u32 7, %s2751_s9  ;;  %s2810_s17 = sshll.u32 %s350_s13, 4 }
  0x8d   :  { %s363_s1 = sand.u32 7, %s2754_s27  ;;  %s2811_s21 = sshll.u32 %s360_s14, 4 }
  0x8e   :  { %s213_s22 = scalar_lea.vmem [#allocation6], %s212_s11  ;;  %s223_s23 = scalar_lea.vmem [#allocation6], %s222_s12 }
  0x8f   :  { %s356_s3 = sadd.s32 %s2810_s17, %s353_s15  ;;  %s366_s26 = sadd.s32 %s2811_s21, %s363_s1 }
  0x90   :  { %s357_s28 = scalar_lea.vmem [#allocation6], %s356_s3  ;;  %s367_s29 = scalar_lea.vmem [#allocation6], %s366_s26 }
  0x91   :  { %s2739_s30 = sld [smem:[#allocation5 + $0x3]]  ;;  %s2745_s27 = sld [smem:[#allocation5 + $0x4]] }
  0x92   :  { %s2742_s9 = sld [smem:[#allocation5 + $0xb]]  ;;  %s2748_s16 = sld [smem:[#allocation5 + $0xc]] }
  0x97   :  { %s254_s6 = sshra.s32 %s2739_s30, 3  ;;  %s257_s0 = sand.u32 7, %s2739_s30 }
  0x98   :  { %s264_s2 = sshra.s32 %s2742_s9, 3  ;;  %s2806_s10 = sshll.u32 %s254_s6, 4 }
  0x99   :  { %s267_s11 = sand.u32 7, %s2742_s9  ;;  %s2807_s12 = sshll.u32 %s264_s2, 4 }
  0x9a   :  { %s260_s13 = sadd.s32 %s2806_s10, %s257_s0  ;;  %s270_s14 = sadd.s32 %s2807_s12, %s267_s11 }
  0x9b   :  { %s302_s15 = sshra.s32 %s2745_s27, 3  ;;  %s312_s17 = sshra.s32 %s2748_s16, 3 }
  0x9c   :  { %s305_s1 = sand.u32 7, %s2745_s27  ;;  %s2808_s21 = sshll.u32 %s302_s15, 4 }
  0x9d   :  { %s261_s3 = scalar_lea.vmem [#allocation6], %s260_s13  ;;  %s271_s26 = scalar_lea.vmem [#allocation6], %s270_s14 }
  0x9e   :  { %s4188_s6 = scalar_lea.vmem [#allocation6], %s3590_s19  ;;  %s4189_s27 = scalar_lea.vmem [#allocation6], %s3592_s20 }
  0x9f   :  { %s4191_s2 = scalar_lea.vmem [#allocation6], %s3598_s25 }
 0x144   :  { %v571_v31 = vpop.f32.mrb[0].mxu0 }
 0x145   :  { %v581_v33 = vadd.f32 %v571_v31, %v153_v28  ;;  %v573_v34 = vpop.f32.mrb[1].mxu0 }
 0x147   :  { %v584_v35 = vmul.f32 %v581_v33, %v3626_v30 }
 0x148   :  { %v576_v37 = vpop.f32.mrb[2].mxu0 }
 0x149   :  { %3143 = vtanh.f32 %v584_v35  ;;  %v577_v38 = vpop.f32.mrb[3].mxu0 }
 0x14a   :  { %v583_v39 = vadd.f32 %v577_v38, %v490_v36 }
 0x14c   :  { %v585_v40 = vmul.f32 %v583_v39, %v3626_v30 }
 0x14e   :  { %3145 = vtanh.f32 %v585_v40 }
 0x153   :  { %v3144_v41 = vpop.eup %3143 }
 0x154   :  { %v588_v43 = vmul.f32 %v3144_v41, %v3626_v30 }
 0x156   :  { %v590_v44 = vadd.f32 %v588_v43, %v3634_v42 }
 0x158   :  { %v3146_v45 = vpop.eup %3145  ;;  %596 = vrot.lane.b32.xlu0 %v590_v44, %s3411_s5  ;;  %v592_v52 = vmul.f32 0.0, %v590_v44 }
 0x159   :  { %v589_v46 = vmul.f32 %v3146_v45, %v3626_v30 }
 0x15b   :  { %v591_v47 = vadd.f32 %v589_v46, %v3634_v42 }
 0x15d   :  { %598 = vrot.lane.b32.xlu0 %v591_v47, %s3411_s5  ;;  %v593_v55 = vmul.f32 0.0, %v591_v47 }
 0x1ca   :  { %v597_v48 = vpop.permute.xlu0 %596 }
 0x1cb   :  { %v602_v49 = vmul.f32 %v597_v48, %v590_v44 }
 0x1cd   :  { %606 = vrot.lane.b32.xlu1 %v602_v49, %s3412_s18 }
 0x1cf   :  { %v599_v50 = vpop.permute.xlu0 %598 }
 0x1d0   :  { %v603_v51 = vmul.f32 %v599_v50, %v591_v47 }
 0x1d2   :  { %608 = vrot.lane.b32.xlu1 %v603_v51, %s3412_s18 }
 0x23f   :  { %v607_v53 = vpop.permute.xlu1 %606 }
 0x240   :  { %v3644_v54 = vadd.f32 %v607_v53, %v592_v52 }
 0x242   :  { %3147 = vtanh.f32 %v3644_v54 }
 0x244   :  { %v609_v56 = vpop.permute.xlu1 %608 }
 0x245   :  { %v3647_v57 = vadd.f32 %v609_v56, %v593_v55  ;;  %v3720_v55 = vld [vmem:[%s213_s22] ss:$8 sm:$0x3]  ;;  %s315_s22 = sand.u32 7, %s2748_s16  ;;  %s3415_s16 = smov [#allocation15]  }
 0x246   :  { %v3722_v56 = vld [vmem:[%s223_s23] ss:$8 sm:$0x3]  ;;  %s2809_s23 = sshll.u32 %s312_s17, 4  ;;  %s2663_s0 = sshll.u32 %s3415_s16, 4  ;;  %s2664_s0 = int_to_ptr.vmem [resolvable:$true] %s2663_s0 }
 0x247   :  { %3149 = vtanh.f32 %v3647_v57  ;;  %p3372_p2 = scmp.lt.s32.totalorder %s2664_s0, %s2664_s0 }
 0x24c   :  { %v3148_v58 = vpop.eup %3147 }
 0x24d   :  { %618 = vrot.lane.b32.xlu0 %v3148_v58, %s3411_s5  ;;  %v240_v58 = vrot.slane %v3722_v56, %v3594_v15 }
 0x251   :  { %v3150_v59 = vpop.eup %3149 }
 0x252   :  { %620 = vrot.lane.b32.xlu1 %v3150_v59, %s3411_s5 }
 0x2bf   :  { %v619_v60 = vpop.permute.xlu0 %618 }
 0x2c0   :  { %v624_v61 = vmul.f32 %v619_v60, %v590_v44  ;;  %v3729_v60 = vld [vmem:[%s357_s28] ss:$8 sm:$0x3]  ;;  %s308_s28 = sadd.s32 %s2808_s21, %s305_s1 }
 0x2c1   :  { %s309_s30 = scalar_lea.vmem [#allocation6], %s308_s28 }
 0x2c2   :  { %627 = vrot.lane.b32.xlu0 %v624_v61, %s3412_s18  ;;  %v3731_v61 = vld [vmem:[%s367_s29] ss:$8 sm:$0x3]  ;;  %s318_s29 = sadd.s32 %s2809_s23, %s315_s22 }
 0x2c3   :  { %s319_s9 = scalar_lea.vmem [#allocation6], %s318_s29 }
 0x2c4   :  { %v621_v62 = vpop.permute.xlu1 %620 }
 0x2c5   :  { %v3653_v63 = vmul.f32 %v621_v62, %v591_v47 }
 0x2c7   :  { %637 = vrot.lane.b32.xlu1 %v3653_v63, %s3412_s18 }
 0x334   :  { %v628_v1 = vpop.permute.xlu0 %627 }
 0x335   :  { %630 = vst.msk [vmem:[#allocation3] sm:$0xff] %vm501_vm5, %v628_v1  ;;  %2769 = vmatmul.mubr.msk.f32.vlgmr.msra.gmra.mrb[0].mxu1 %vm501_vm5, %v628_v1  ;;  %v377_v1 = vrot.slane %v3729_v60, %v3608_v21 }
 0x336   :  { %712 = vmatprep.mubr.f32.mxu1 %v3409_v0  ;;  %2999 = vmatpush1.bf16.msra.mxu1 %v3566_v8 }
 0x337   :  { %3001 = vmatprep.subr.bf16.mxu1 %v3568_v9 }
 0x339   :  { %v638_v2 = vpop.permute.xlu1 %637 }
 0x33a   :  { %2770 = vmatmul.mubr.msk.f32.gmra.mrb[2].mxu1 %vm501_vm5, %v638_v2  ;;  %v388_v2 = vrot.slane %v3731_v61, %v3608_v21 }
 0x33b   :  { %3003 = vmatpush1.bf16.msra.mxu1 %v3573_v12  ;;  %981 = vmatprep.mubr.f32.mxu1 %v3409_v0 }
 0x33c   :  { %3013 = vmatprep.subr.bf16.mxu1 %v3564_v4  ;;  %v392_v14 = vsel %vm149_vm0, %v377_v1, %v388_v2 }
 0x408   :  { %v709_v18 = vpop.f32.mrb[0].mxu1 }
 0x409   :  { %v719_v19 = vadd.f32 %v709_v18, %v201_v17  ;;  %v711_v20 = vpop.f32.mrb[1].mxu1  ;;  %v394_v17 = vsel %vm152_vm3, %v392_v14, 0.0 }
 0x40b   :  { %v722_v23 = vmul.f32 %v719_v19, %v3626_v30 }
 0x40d   :  { %3151 = vtanh.f32 %v722_v23  ;;  %v714_v25 = vpop.f32.mrb[2].mxu1 }
 0x40e   :  { %v715_v26 = vpop.f32.mrb[3].mxu1 }
 0x40f   :  { %v721_v27 = vadd.f32 %v715_v26, %v442_v24 }
 0x411   :  { %v723_v28 = vmul.f32 %v721_v27, %v3626_v30 }
 0x413   :  { %3153 = vtanh.f32 %v723_v28 }
 0x417   :  { %v3152_v29 = vpop.eup %3151 }
 0x418   :  { %v726_v31 = vmul.f32 %v3152_v29, %v3626_v30 }
 0x41a   :  { %v728_v32 = vadd.f32 %v726_v31, %v3634_v42 }
 0x41c   :  { %734 = vrot.lane.b32.xlu0 %v728_v32, %s3411_s5  ;;  %v730_v40 = vmul.f32 %v728_v32, %v3644_v54 }
 0x41d   :  { %v3154_v33 = vpop.eup %3153 }
 0x41e   :  { %v727_v34 = vmul.f32 %v3154_v33, %v3626_v30 }
 0x420   :  { %v729_v35 = vadd.f32 %v727_v34, %v3634_v42 }
 0x422   :  { %736 = vrot.lane.b32.xlu1 %v729_v35, %s3411_s5  ;;  %v731_v44 = vmul.f32 %v729_v35, %v3647_v57  ;;  %v229_v57 = vrot.slane %v3720_v55, %v3594_v15 }
 0x424   :  { %v247_v59 = vsel %vm149_vm0, %v229_v57, %v240_v58  ;;  %v320_v57 = vld [vmem:[%s319_s9] ss:$8 sm:$0x3] }
 0x425   :  { %v249_v62 = vsel %vm152_vm3, %v247_v59, 0.0 }
 0x48e   :  { %v735_v36 = vpop.permute.xlu0 %734 }
 0x48f   :  { %v740_v37 = vmul.f32 %v735_v36, %v728_v32 }
 0x491   :  { %744 = vrot.lane.b32.xlu0 %v740_v37, %s3412_s18 }
 0x494   :  { %v737_v38 = vpop.permute.xlu1 %736 }
 0x495   :  { %v741_v39 = vmul.f32 %v737_v38, %v729_v35 }
 0x497   :  { %746 = vrot.lane.b32.xlu1 %v741_v39, %s3412_s18 }
 0x503   :  { %v745_v41 = vpop.permute.xlu0 %744 }
 0x504   :  { %v3697_v43 = vadd.f32 %v745_v41, %v730_v40 }
 0x506   :  { %3155 = vtanh.f32 %v3697_v43 }
 0x509   :  { %v747_v45 = vpop.permute.xlu1 %746 }
 0x50a   :  { %v3701_v46 = vadd.f32 %v747_v45, %v731_v44 }
 0x50c   :  { %3157 = vtanh.f32 %v3701_v46 }
 0x510   :  { %v3156_v47 = vpop.eup %3155 }
 0x511   :  { %756 = vrot.lane.b32.xlu0 %v3156_v47, %s3411_s5 }
 0x516   :  { %v3158_v48 = vpop.eup %3157 }
 0x517   :  { %758 = vrot.lane.b32.xlu1 %v3158_v48, %s3411_s5 }
 0x583   :  { %v757_v49 = vpop.permute.xlu0 %756 }
 0x584   :  { %v762_v50 = vmul.f32 %v757_v49, %v728_v32  ;;  %v3776_v49 = vld [vmem:[%s271_s26] ss:$8 sm:$0x3] }
 0x586   :  { %765 = vrot.lane.b32.xlu0 %v762_v50, %s3412_s18 }
 0x589   :  { %v759_v51 = vpop.permute.xlu1 %758 }
 0x58a   :  { %v3707_v52 = vmul.f32 %v759_v51, %v729_v35  ;;  %v288_v51 = vrot.slane %v3776_v49, %v3594_v15 }
 0x58c   :  { %774 = vrot.lane.b32.xlu1 %v3707_v52, %s3412_s18 }
 0x5f8   :  { %v766_v53 = vpop.permute.xlu0 %765 }
 0x5f9   :  { %768 = vst.msk [vmem:[#allocation3 + $0x8] sm:$0xff] %vm501_vm5, %v766_v53  ;;  %2771 = vmatmul.mubr.msk.f32.vlgmr.msra.gmra.mrb[4].mxu0 %vm501_vm5, %v766_v53 }
 0x5fa   :  { %849 = vmatprep.mubr.f32.mxu0 %v3409_v0  ;;  %3007 = vmatpush1.bf16.msra.mxu0 %v3566_v8 }
 0x5fb   :  { %3009 = vmatprep.subr.bf16.mxu0 %v3568_v9 }
 0x5fe   :  { %v775_v54 = vpop.permute.xlu1 %774  ;;  %3011 = vmatpush1.bf16.msra.mxu0 %v3573_v12 }
 0x5ff   :  { %2772 = vmatmul.mubr.msk.f32.gmra.mrb[6].mxu0 %vm501_vm5, %v775_v54  ;;  %3021 = vmatprep.subr.bf16.mxu0 %v3564_v4  ;;  %v3783_v54 = vld [vmem:[%s309_s30] ss:$8 sm:$0x3] }
 0x600   :  { %1118 = vmatprep.mubr.f32.mxu0 %v3409_v0  ;;  %v329_v59 = vrot.slane %v3783_v54, %v3608_v21 }
 0x6cc   :  { %v846_v6 = vpop.f32.mrb[4].mxu0 }
 0x6cd   :  { %v856_v7 = vadd.f32 %v846_v6, %v249_v62  ;;  %v848_v13 = vpop.f32.mrb[5].mxu0  ;;  %v340_v62 = vrot.slane %v320_v57, %v3608_v21 }
 0x6cf   :  { %v859_v16 = vmul.f32 %v856_v7, %v3626_v30  ;;  %v344_v13 = vsel %vm149_vm0, %v329_v59, %v340_v62  ;;  %v292_v62 = vrot.slane %v3776_v49, %v3608_v21 }
 0x6d0   :  { %v346_v14 = vsel %vm152_vm3, %v344_v13, 0.0 }
 0x6d1   :  { %3159 = vtanh.f32 %v859_v16 }
 0x6d2   :  { %v851_v18 = vpop.f32.mrb[6].mxu0 }
 0x6d3   :  { %v852_v19 = vpop.f32.mrb[7].mxu0 }
 0x6d4   :  { %v858_v20 = vadd.f32 %v852_v19, %v394_v17 }
 0x6d6   :  { %v860_v22 = vmul.f32 %v858_v20, %v3626_v30 }
 0x6d8   :  { %3161 = vtanh.f32 %v860_v22 }
 0x6db   :  { %v3160_v23 = vpop.eup %3159 }
 0x6dc   :  { %v863_v24 = vmul.f32 %v3160_v23, %v3626_v30 }
 0x6de   :  { %v865_v25 = vadd.f32 %v863_v24, %v3634_v42 }
 0x6e0   :  { %871 = vrot.lane.b32.xlu0 %v865_v25, %s3411_s5  ;;  %v867_v34 = vmul.f32 %v865_v25, %v3697_v43 }
 0x6e2   :  { %v3162_v26 = vpop.eup %3161 }
 0x6e3   :  { %v864_v27 = vmul.f32 %v3162_v26, %v3626_v30 }
 0x6e5   :  { %v866_v28 = vadd.f32 %v864_v27, %v3634_v42 }
 0x6e7   :  { %873 = vrot.lane.b32.xlu1 %v866_v28, %s3411_s5  ;;  %v868_v37 = vmul.f32 %v866_v28, %v3701_v46 }
 0x752   :  { %v872_v29 = vpop.permute.xlu0 %871 }
 0x753   :  { %v877_v31 = vmul.f32 %v872_v29, %v865_v25 }
 0x755   :  { %881 = vrot.lane.b32.xlu0 %v877_v31, %s3412_s18 }
 0x759   :  { %v874_v32 = vpop.permute.xlu1 %873 }
 0x75a   :  { %v878_v33 = vmul.f32 %v874_v32, %v866_v28 }
 0x75c   :  { %883 = vrot.lane.b32.xlu1 %v878_v33, %s3412_s18 }
 0x7c7   :  { %v882_v35 = vpop.permute.xlu0 %881 }
 0x7c8   :  { %v3751_v36 = vadd.f32 %v882_v35, %v867_v34 }
 0x7ca   :  { %3163 = vtanh.f32 %v3751_v36 }
 0x7ce   :  { %v884_v38 = vpop.permute.xlu1 %883 }
 0x7cf   :  { %v3755_v39 = vadd.f32 %v884_v38, %v868_v37 }
 0x7d1   :  { %3165 = vtanh.f32 %v3755_v39 }
 0x7d4   :  { %v3164_v40 = vpop.eup %3163 }
 0x7d5   :  { %893 = vrot.lane.b32.xlu0 %v3164_v40, %s3411_s5 }
 0x7db   :  { %v3166_v41 = vpop.eup %3165 }
 0x7dc   :  { %895 = vrot.lane.b32.xlu1 %v3166_v41, %s3411_s5 }
 0x847   :  { %v894_v44 = vpop.permute.xlu0 %893 }
 0x848   :  { %v899_v43 = vmul.f32 %v894_v44, %v865_v25 }
 0x84a   :  { %902 = vrot.lane.b32.xlu0 %v899_v43, %s3412_s18 }
 0x84e   :  { %v896_v45 = vpop.permute.xlu1 %895 }
 0x84f   :  { %v3761_v47 = vmul.f32 %v896_v45, %v866_v28 }
 0x851   :  { %911 = vrot.lane.b32.xlu1 %v3761_v47, %s3412_s18 }
 0x8bc   :  { %v903_v46 = vpop.permute.xlu0 %902 }
 0x8bd   :  { %905 = vst.msk [vmem:[#allocation3 + $0x10] sm:$0xff] %vm501_vm5, %v903_v46  ;;  %2773 = vmatmul.mubr.msk.f32.vlgmr.msra.gmra.mrb[4].mxu1 %vm501_vm5, %v903_v46 }
 0x8be   :  { %986 = vmatprep.mubr.f32.mxu1 %v3409_v0  ;;  %3015 = vmatpush1.bf16.msra.mxu1 %v3566_v8 }
 0x8bf   :  { %3017 = vmatprep.subr.bf16.mxu1 %v3568_v9 }
 0x8c2   :  { %3019 = vmatpush1.bf16.msra.mxu1 %v3573_v12 }
 0x8c3   :  { %v912_v48 = vpop.permute.xlu1 %911  ;;  %3029 = vmatprep.subr.bf16.mxu1 %v3564_v4  ;;  %v3774_v4 = vld [vmem:[%s261_s3] ss:$8 sm:$0x3] }
 0x8c4   :  { %2774 = vmatmul.mubr.msk.f32.gmra.mrb[6].mxu1 %vm501_vm5, %v912_v48  ;;  %v277_v50 = vrot.slane %v3774_v4, %v3594_v15  ;;  %v325_v48 = vrot.slane %v3783_v54, %v3594_v15  ;;  %v281_v59 = vrot.slane %v3774_v4, %v3608_v21 }
 0x8c5   :  { %1255 = vmatprep.mubr.f32.mxu1 %v3409_v0 }
 0x8c6   :  { %v295_v53 = vsel %vm149_vm0, %v277_v50, %v288_v51  ;;  %v336_v50 = vrot.slane %v320_v57, %v3594_v15 }
 0x8c7   :  { %v297_v58 = vsel %vm152_vm3, %v295_v53, 0.0 }
 0x8c8   :  { %v343_v51 = vsel %vm149_vm0, %v325_v48, %v336_v50  ;;  %v244_v50 = vrot.slane %v3722_v56, %v3608_v21 }
 0x8c9   :  { %v345_v53 = vsel %vm152_vm3, %v343_v51, 0.0 }
 0x990   :  { %v983_v1 = vpop.f32.mrb[4].mxu1 }
 0x991   :  { %v993_v2 = vadd.f32 %v983_v1, %v297_v58  ;;  %v985_v6 = vpop.f32.mrb[5].mxu1 }
 0x993   :  { %v996_v7 = vmul.f32 %v993_v2, %v3626_v30 }
 0x995   :  { %3167 = vtanh.f32 %v996_v7  ;;  %v296_v7 = vsel %vm149_vm0, %v281_v59, %v292_v62 }
 0x996   :  { %v298_v54 = vsel %vm152_vm3, %v296_v7, 0.0 }
 0x997   :  { %v988_v16 = vpop.f32.mrb[6].mxu1 }
 0x998   :  { %v989_v17 = vpop.f32.mrb[7].mxu1 }
 0x999   :  { %v995_v18 = vadd.f32 %v989_v17, %v346_v14 }
 0x99b   :  { %v997_v19 = vmul.f32 %v995_v18, %v3626_v30 }
 0x99d   :  { %3169 = vtanh.f32 %v997_v19 }
 0x99f   :  { %v3168_v20 = vpop.eup %3167 }
 0x9a0   :  { %v1000_v22 = vmul.f32 %v3168_v20, %v3626_v30 }
 0x9a2   :  { %v1002_v23 = vadd.f32 %v1000_v22, %v3634_v42 }
 0x9a4   :  { %1008 = vrot.lane.b32.xlu0 %v1002_v23, %s3411_s5  ;;  %v1004_v32 = vmul.f32 %v1002_v23, %v3751_v36 }
 0x9a7   :  { %v3170_v24 = vpop.eup %3169 }
 0x9a8   :  { %v1001_v25 = vmul.f32 %v3170_v24, %v3626_v30 }
 0x9aa   :  { %v1003_v26 = vadd.f32 %v1001_v25, %v3634_v42 }
 0x9ac   :  { %1010 = vrot.lane.b32.xlu1 %v1003_v26, %s3411_s5  ;;  %v1005_v35 = vmul.f32 %v1003_v26, %v3755_v39 }
 0xa16   :  { %v1009_v27 = vpop.permute.xlu0 %1008 }
 0xa17   :  { %v1014_v28 = vmul.f32 %v1009_v27, %v1002_v23 }
 0xa19   :  { %1018 = vrot.lane.b32.xlu0 %v1014_v28, %s3412_s18 }
 0xa1e   :  { %v1011_v29 = vpop.permute.xlu1 %1010 }
 0xa1f   :  { %v1015_v31 = vmul.f32 %v1011_v29, %v1003_v26 }
 0xa21   :  { %1020 = vrot.lane.b32.xlu1 %v1015_v31, %s3412_s18 }
 0xa8b   :  { %v1019_v33 = vpop.permute.xlu0 %1018 }
 0xa8c   :  { %v1024_v34 = vadd.f32 %v1019_v33, %v1004_v32 }
 0xa8e   :  { %3171 = vtanh.f32 %v1024_v34 }
 0xa93   :  { %v1021_v37 = vpop.permute.xlu1 %1020 }
 0xa94   :  { %v1025_v38 = vadd.f32 %v1021_v37, %v1005_v35 }
 0xa96   :  { %3173 = vtanh.f32 %v1025_v38 }
 0xa98   :  { %v3172_v40 = vpop.eup %3171 }
 0xa99   :  { %1030 = vrot.lane.b32.xlu0 %v3172_v40, %s3411_s5 }
 0xaa0   :  { %v3174_v41 = vpop.eup %3173 }
 0xaa1   :  { %1032 = vrot.lane.b32.xlu1 %v3174_v41, %s3411_s5 }
 0xb0b   :  { %v1031_v44 = vpop.permute.xlu0 %1030 }
 0xb0c   :  { %v1036_v43 = vmul.f32 %v1031_v44, %v1002_v23 }
 0xb0e   :  { %1039 = vrot.lane.b32.xlu0 %v1036_v43, %s3412_s18  ;;  %v373_v43 = vrot.slane %v3729_v60, %v3594_v15 }
 0xb13   :  { %v1033_v45 = vpop.permute.xlu1 %1032 }
 0xb14   :  { %v3806_v36 = vmul.f32 %v1033_v45, %v1003_v26  ;;  %v384_v45 = vrot.slane %v3731_v61, %v3594_v15 }
 0xb16   :  { %1048 = vrot.lane.b32.xlu1 %v3806_v36, %s3412_s18 }
 0xb80   :  { %v1040_v39 = vpop.permute.xlu0 %1039 }
 0xb81   :  { %1042 = vst.msk [vmem:[#allocation3 + $0x18] sm:$0xff] %vm501_vm5, %v1040_v39  ;;  %2775 = vmatmul.mubr.msk.f32.vlgmr.msra.gmra.mrb[8].mxu0 %vm501_vm5, %v1040_v39  ;;  %v391_v39 = vsel %vm149_vm0, %v373_v43, %v384_v45 }
 0xb82   :  { %1123 = vmatprep.mubr.f32.mxu0 %v3409_v0  ;;  %3023 = vmatpush1.bf16.msra.mxu0 %v3566_v8 }
 0xb83   :  { %3025 = vmatprep.subr.bf16.mxu0 %v3568_v9 }
 0xb86   :  { %3027 = vmatpush1.bf16.msra.mxu0 %v3573_v12 }
 0xb88   :  { %v1049_v46 = vpop.permute.xlu1 %1048 }
 0xb89   :  { %2776 = vmatmul.mubr.msk.f32.gmra.mrb[10].mxu0 %vm501_vm5, %v1049_v46  ;;  %v393_v46 = vsel %vm152_vm3, %v391_v39, 0.0 }
 0xb8a   :  { %1392 = vmatprep.mubr.f32.mxu0 %v3409_v0 }
 0xc54   :  { %v1120_v58 = vpop.f32.mrb[8].mxu0 }
 0xc55   :  { %v1130_v1 = vadd.f32 %v1120_v58, %v345_v53  ;;  %v1122_v2 = vpop.f32.mrb[9].mxu0 }
 0xc57   :  { %v1133_v6 = vmul.f32 %v1130_v1, %v3626_v30 }
 0xc59   :  { %3175 = vtanh.f32 %v1133_v6 }
 0xc5c   :  { %v1125_v57 = vpop.f32.mrb[10].mxu0 }
 0xc5d   :  { %v1126_v13 = vpop.f32.mrb[11].mxu0 }
 0xc5e   :  { %v1132_v14 = vadd.f32 %v1126_v13, %v298_v54 }
 0xc60   :  { %v1134_v16 = vmul.f32 %v1132_v14, %v3626_v30 }
 0xc62   :  { %3177 = vtanh.f32 %v1134_v16 }
 0xc63   :  { %v3176_v17 = vpop.eup %3175 }
 0xc64   :  { %v1137_v4 = vmul.f32 %v3176_v17, %v3626_v30 }
 0xc66   :  { %v1139_v49 = vadd.f32 %v1137_v4, %v3634_v42 }
 0xc68   :  { %1145 = vrot.lane.b32.xlu0 %v1139_v49, %s3411_s5  ;;  %v1141_v26 = vmul.f32 %v1139_v49, %v1024_v34 }
 0xc6c   :  { %v3178_v18 = vpop.eup %3177 }
 0xc6d   :  { %v1138_v19 = vmul.f32 %v3178_v18, %v3626_v30 }
 0xc6f   :  { %v1140_v20 = vadd.f32 %v1138_v19, %v3634_v42 }
 0xc71   :  { %1147 = vrot.lane.b32.xlu1 %v1140_v20, %s3411_s5  ;;  %v1142_v29 = vmul.f32 %v1140_v20, %v1025_v38 }
 0xcda   :  { %v1146_v22 = vpop.permute.xlu0 %1145 }
 0xcdb   :  { %v1151_v23 = vmul.f32 %v1146_v22, %v1139_v49 }
 0xcdd   :  { %1155 = vrot.lane.b32.xlu0 %v1151_v23, %s3412_s18 }
 0xce3   :  { %v1148_v24 = vpop.permute.xlu1 %1147 }
 0xce4   :  { %v1152_v25 = vmul.f32 %v1148_v24, %v1140_v20 }
 0xce6   :  { %1157 = vrot.lane.b32.xlu1 %v1152_v25, %s3412_s18 }
 0xd4f   :  { %v1156_v27 = vpop.permute.xlu0 %1155 }
 0xd50   :  { %v1161_v28 = vadd.f32 %v1156_v27, %v1141_v26 }
 0xd52   :  { %3179 = vtanh.f32 %v1161_v28 }
 0xd58   :  { %v1158_v31 = vpop.permute.xlu1 %1157 }
 0xd59   :  { %v1162_v32 = vadd.f32 %v1158_v31, %v1142_v29  ;;  %v421_v29 = vrot.slane %v3674_v10, %v3594_v15  ;;  %v432_v31 = vrot.slane %v3676_v11, %v3594_v15 }
 0xd5b   :  { %3181 = vtanh.f32 %v1162_v32 }
 0xd5c   :  { %v3180_v33 = vpop.eup %3179 }
 0xd5d   :  { %1167 = vrot.lane.b32.xlu0 %v3180_v33, %s3411_s5 }
 0xd65   :  { %v3182_v35 = vpop.eup %3181 }
 0xd66   :  { %1169 = vrot.lane.b32.xlu1 %v3182_v35, %s3411_s5 }
 0xdcf   :  { %v1168_v37 = vpop.permute.xlu0 %1167 }
 0xdd0   :  { %v1173_v40 = vmul.f32 %v1168_v37, %v1139_v49 }
 0xdd2   :  { %1176 = vrot.lane.b32.xlu0 %v1173_v40, %s3412_s18 }
 0xdd8   :  { %v1170_v41 = vpop.permute.xlu1 %1169 }
 0xdd9   :  { %v3842_v44 = vmul.f32 %v1170_v41, %v1140_v20  ;;  %v185_v41 = vrot.slane %v3666_v3, %v3608_v21 }
 0xddb   :  { %1185 = vrot.lane.b32.xlu1 %v3842_v44, %s3412_s18 }
 0xe44   :  { %v3846_v34 = vpop.permute.xlu0 %1176 }
 0xe45   :  { %2777 = vmatmul.mubr.msk.f32.vlgmr.msra.gmra.mrb[8].mxu1 %vm501_vm5, %v3846_v34 }
 0xe46   :  { %1260 = vmatprep.mubr.f32.mxu1 %v3409_v0  ;;  %3031 = vmatpush1.bf16.msra.mxu1 %v3566_v8 }
 0xe47   :  { %3033 = vmatprep.subr.bf16.mxu1 %v3568_v9 }
 0xe4a   :  { %3035 = vmatpush1.bf16.msra.mxu1 %v3573_v12  ;;  %v233_v12 = vrot.slane %v3720_v55, %v3608_v21 }
 0xe4c   :  { %v248_v60 = vsel %vm149_vm0, %v233_v12, %v244_v50 }
 0xe4d   :  { %v1186_v38 = vpop.permute.xlu1 %1185  ;;  %v250_v61 = vsel %vm152_vm3, %v248_v60, 0.0 }
 0xe4e   :  { %2778 = vmatmul.mubr.msk.f32.gmra.mrb[10].mxu1 %vm501_vm5, %v1186_v38  ;;  %v196_v38 = vrot.slane %v3668_v5, %v3608_v21 }
 0xe4f   :  { %1529 = vmatprep.mubr.f32.mxu1 %v3409_v0 }
 0xe50   :  { %v200_v10 = vsel %vm149_vm0, %v185_v41, %v196_v38 }
 0xe51   :  { %v202_v11 = vsel %vm152_vm3, %v200_v10, 0.0  ;;  %v1607_v10 = vld [vmem:[#allocation11 + $0x18] sm:$0xff] }
 0xf18   :  { %v1257_v8 = vpop.f32.mrb[8].mxu1 }
 0xf19   :  { %v1267_v48 = vadd.f32 %v1257_v8, %v393_v46  ;;  %v1259_v9 = vpop.f32.mrb[9].mxu1 }
 0xf1b   :  { %v1270_v51 = vmul.f32 %v1267_v48, %v3626_v30 }
 0xf1d   :  { %3183 = vtanh.f32 %v1270_v51 }
 0xf21   :  { %v1262_v53 = vpop.f32.mrb[10].mxu1 }
 0xf22   :  { %v1263_v58 = vpop.f32.mrb[11].mxu1 }
 0xf23   :  { %v1269_v59 = vadd.f32 %v1263_v58, %v250_v61 }
 0xf25   :  { %v1271_v62 = vmul.f32 %v1269_v59, %v3626_v30 }
 0xf27   :  { %v3184_v1 = vpop.eup %3183  ;;  %3185 = vtanh.f32 %v1271_v62 }
 0xf28   :  { %v1274_v2 = vmul.f32 %v3184_v1, %v3626_v30 }
 0xf2a   :  { %v1276_v55 = vadd.f32 %v1274_v2, %v3634_v42 }
 0xf2c   :  { %1282 = vrot.lane.b32.xlu0 %v1276_v55, %s3411_s5  ;;  %v1278_v16 = vmul.f32 %v1276_v55, %v1161_v28 }
 0xf31   :  { %v3186_v56 = vpop.eup %3185 }
 0xf32   :  { %v1275_v6 = vmul.f32 %v3186_v56, %v3626_v30 }
 0xf34   :  { %v1277_v7 = vadd.f32 %v1275_v6, %v3634_v42 }
 0xf36   :  { %1284 = vrot.lane.b32.xlu1 %v1277_v7, %s3411_s5  ;;  %v1279_v49 = vmul.f32 %v1277_v7, %v1162_v32  ;;  %v439_v32 = vsel %vm149_vm0, %v421_v29, %v432_v31 }
 0xf37   :  { %v441_v33 = vsel %vm152_vm3, %v439_v32, 0.0 }
 0xf9e   :  { %v1283_v54 = vpop.permute.xlu0 %1282 }
 0xf9f   :  { %v1288_v57 = vmul.f32 %v1283_v54, %v1276_v55 }
 0xfa1   :  { %1292 = vrot.lane.b32.xlu0 %v1288_v57, %s3412_s18 }
 0xfa8   :  { %v1285_v13 = vpop.permute.xlu1 %1284 }
 0xfa9   :  { %v1289_v14 = vmul.f32 %v1285_v13, %v1277_v7 }
 0xfab   :  { %1294 = vrot.lane.b32.xlu1 %v1289_v14, %s3412_s18 }
0x1013   :  { %v1293_v17 = vpop.permute.xlu0 %1292 }
0x1014   :  { %v1298_v4 = vadd.f32 %v1293_v17, %v1278_v16 }
0x1016   :  { %3187 = vtanh.f32 %v1298_v4 }
0x101d   :  { %v1295_v18 = vpop.permute.xlu1 %1294 }
0x101e   :  { %v1299_v19 = vadd.f32 %v1295_v18, %v1279_v49  ;;  %v3243_v49 = vld [vmem:[%s4188_s6] ss:$8 sm:$0x3] }
0x101f   :  { %v135_v18 = vrot.slane %v3243_v49, %v3608_v21  ;;  %v1766_v49 = vld [vmem:[#allocation12 + $0x18] sm:$0xff] }
0x1020   :  { %v3188_v20 = vpop.eup %3187  ;;  %3189 = vtanh.f32 %v1299_v19 }
0x1021   :  { %1304 = vrot.lane.b32.xlu0 %v3188_v20, %s3411_s5 }
0x102a   :  { %v3190_v22 = vpop.eup %3189 }
0x102b   :  { %1306 = vrot.lane.b32.xlu1 %v3190_v22, %s3411_s5 }
0x1093   :  { %v1305_v23 = vpop.permute.xlu0 %1304 }
0x1094   :  { %v1310_v24 = vmul.f32 %v1305_v23, %v1276_v55 }
0x1096   :  { %1313 = vrot.lane.b32.xlu0 %v1310_v24, %s3412_s18 }
0x109d   :  { %v1307_v25 = vpop.permute.xlu1 %1306 }
0x109e   :  { %v3881_v26 = vmul.f32 %v1307_v25, %v1277_v7 }
0x10a0   :  { %1322 = vrot.lane.b32.xlu1 %v3881_v26, %s3412_s18 }
0x1108   :  { %v3885_v27 = vpop.permute.xlu0 %1313 }
0x1109   :  { %2779 = vmatmul.mubr.msk.f32.vlgmr.msra.gmra.mrb[12].mxu0 %vm501_vm5, %v3885_v27 }
0x110a   :  { %1397 = vmatprep.mubr.f32.mxu0 %v3409_v0 }
0x1112   :  { %v1323_v28 = vpop.permute.xlu1 %1322 }
0x1113   :  { %2780 = vmatmul.mubr.msk.f32.gmra.mrb[14].mxu0 %vm501_vm5, %v1323_v28 }
0x1114   :  { %2873 = vmatprep.mubr.msk.f32.mxu0 %vm3414_vm6, %v3409_v0 }
0x11dc   :  { %v1394_v35 = vpop.f32.mrb[12].mxu0 }
0x11dd   :  { %v1404_v37 = vadd.f32 %v1394_v35, %v441_v33  ;;  %v1396_v40 = vpop.f32.mrb[13].mxu0 }
0x11df   :  { %v1407_v43 = vmul.f32 %v1404_v37, %v3626_v30 }
0x11e1   :  { %3191 = vtanh.f32 %v1407_v43  ;;  %v1605_v43 = vld [vmem:[#allocation11 + $0x8] sm:$0xff] }
0x11e6   :  { %v1399_v45 = vpop.f32.mrb[14].mxu0 }
0x11e7   :  { %v1400_v39 = vpop.f32.mrb[15].mxu0  ;;  %v3036_v45 = vpack.c.bf16 %v1607_v10, %v1605_v43 }
0x11e8   :  { %v1406_v46 = vadd.f32 %v1400_v39, %v202_v11  ;;  %v1604_v11 = vld [vmem:[#allocation11] sm:$0xff]  ;;  %v1606_v39 = vld [vmem:[#allocation11 + $0x10] sm:$0xff] }
0x11e9   :  { %3037 = vmatprep.subr.bf16.mxu1 %v3036_v45 }
0x11ea   :  { %v1408_v8 = vmul.f32 %v1406_v46, %v3626_v30  ;;  %v1609_v46 = vld [vmem:[#allocation11 + $0x28] sm:$0xff] }
0x11eb   :  { %v3192_v48 = vpop.eup %3191 }
0x11ec   :  { %3193 = vtanh.f32 %v1408_v8  ;;  %v1411_v9 = vmul.f32 %v3192_v48, %v3626_v30  ;;  %v1611_v8 = vld [vmem:[#allocation11 + $0x38] sm:$0xff]  ;;  %v3038_v48 = vpack.c.bf16 %v1606_v39, %v1604_v11 }
0x11ee   :  { %v1413_v3 = vadd.f32 %v1411_v9, %v3634_v42  ;;  %v3040_v9 = vpack.c.bf16 %v1611_v8, %v1609_v46 }
0x11f0   :  { %1419 = vrot.lane.b32.xlu0 %v1413_v3, %s3411_s5  ;;  %v1415_v58 = vmul.f32 %v1413_v3, %v1298_v4 }
0x11f6   :  { %v3194_v5 = vpop.eup %3193 }
0x11f7   :  { %v1412_v12 = vmul.f32 %v3194_v5, %v3626_v30  ;;  %v1610_v5 = vld [vmem:[#allocation11 + $0x30] sm:$0xff] }
0x11f9   :  { %v1414_v50 = vadd.f32 %v1412_v12, %v3634_v42 }
0x11fb   :  { %1421 = vrot.lane.b32.xlu1 %v1414_v50, %s3411_s5  ;;  %v1416_v1 = vmul.f32 %v1414_v50, %v1299_v19  ;;  %v3244_v19 = vld [vmem:[%s4189_s27] ss:$8 sm:$0x3] }
0x11fc   :  { %v146_v20 = vrot.slane %v3244_v19, %v3608_v21 }
0x11fe   :  { %v151_v22 = vsel %vm149_vm0, %v135_v18, %v146_v20 }
0x11ff   :  { %v154_v23 = vsel %vm152_vm3, %v151_v22, 0.0 }
0x1262   :  { %v1420_v51 = vpop.permute.xlu0 %1419 }
0x1263   :  { %v1425_v60 = vmul.f32 %v1420_v51, %v1413_v3  ;;  %v1613_v51 = vld [vmem:[#allocation11 + $0x48] sm:$0xff] }
0x1265   :  { %1429 = vrot.lane.b32.xlu0 %v1425_v60, %s3412_s18  ;;  %v1615_v60 = vld [vmem:[#allocation11 + $0x58] sm:$0xff] }
0x126d   :  { %v1422_v61 = vpop.permute.xlu1 %1421 }
0x126e   :  { %v1426_v53 = vmul.f32 %v1422_v61, %v1414_v50  ;;  %v3044_v61 = vpack.c.bf16 %v1615_v60, %v1613_v51 }
0x1270   :  { %1431 = vrot.lane.b32.xlu1 %v1426_v53, %s3412_s18  ;;  %v1612_v53 = vld [vmem:[#allocation11 + $0x40] sm:$0xff] }
0x12d7   :  { %v1430_v59 = vpop.permute.xlu0 %1429 }
0x12d8   :  { %v3913_v62 = vadd.f32 %v1430_v59, %v1415_v58  ;;  %v1614_v58 = vld [vmem:[#allocation11 + $0x50] sm:$0xff] }
0x12d9   :  { %v3046_v59 = vpack.c.bf16 %v1614_v58, %v1612_v53 }
0x12da   :  { %3195 = vtanh.f32 %v3913_v62 }
0x12e2   :  { %v1432_v2 = vpop.permute.xlu1 %1431 }
0x12e3   :  { %v1436_v55 = vadd.f32 %v1432_v2, %v1416_v1  ;;  %v1763_v1 = vld [vmem:[#allocation12] sm:$0xff]  ;;  %v1764_v2 = vld [vmem:[#allocation12 + $0x8] sm:$0xff] }
0x12e4   :  { %v3196_v56 = vpop.eup %3195 }
0x12e5   :  { %3197 = vtanh.f32 %v1436_v55  ;;  %1441 = vrot.lane.b32.xlu0 %v3196_v56, %s3411_s5  ;;  %v1617_v56 = vld [vmem:[#allocation11 + $0x68] sm:$0xff] }
0x12ef   :  { %v3198_v6 = vpop.eup %3197 }
0x12f0   :  { %1443 = vrot.lane.b32.xlu1 %v3198_v6, %s3411_s5  ;;  %v1619_v6 = vld [vmem:[#allocation11 + $0x78] sm:$0xff] }
0x1357   :  { %v1442_v7 = vpop.permute.xlu0 %1441 }
0x1358   :  { %v1447_v54 = vmul.f32 %v1442_v7, %v1413_v3  ;;  %v1608_v3 = vld [vmem:[#allocation11 + $0x20] sm:$0xff] }
0x1359   :  { %v3042_v12 = vpack.c.bf16 %v1610_v5, %v1608_v3  ;;  %v1616_v7 = vld [vmem:[#allocation11 + $0x60] sm:$0xff] }
0x135a   :  { %1450 = vrot.lane.b32.xlu0 %v1447_v54, %s3412_s18  ;;  %v3413_v54 = vmov 0.0|0.0  }
0x135b   :  { %3052 = vmatprep.subr.bf16.mxu0 %v3413_v54 }
0x1362   :  { %v1444_v57 = vpop.permute.xlu1 %1443 }
0x1363   :  { %v3919_v13 = vmul.f32 %v1444_v57, %v1414_v50  ;;  %v3048_v57 = vpack.c.bf16 %v1619_v6, %v1617_v56 }
0x1365   :  { %1459 = vrot.lane.b32.xlu1 %v3919_v13, %s3412_s18 }
0x13cc   :  { %v3923_v14 = vpop.permute.xlu0 %1450 }
0x13cd   :  { %2781 = vmatmul.mubr.msk.f32.vlgmr.msra.gmra.mrb[12].mxu1 %vm501_vm5, %v3923_v14 }
0x13ce   :  { %1534 = vmatprep.mubr.f32.mxu1 %v3409_v0  ;;  %3039 = vmatpush1.bf16.msra.mxu1 %v3038_v48 }
0x13cf   :  { %3041 = vmatprep.subr.bf16.mxu1 %v3040_v9 }
0x13d2   :  { %3043 = vmatpush1.bf16.msra.mxu1 %v3042_v12 }
0x13d3   :  { %3045 = vmatprep.subr.bf16.mxu1 %v3044_v61 }
0x13d6   :  { %3047 = vmatpush1.bf16.msra.mxu1 %v3046_v59 }
0x13d7   :  { %v1460_v16 = vpop.permute.xlu1 %1459  ;;  %3049 = vmatprep.subr.bf16.mxu1 %v3048_v57 }
0x13d8   :  { %2782 = vmatmul.mubr.msk.f32.gmra.mrb[14].mxu1 %vm501_vm5, %v1460_v16  ;;  %v1618_v16 = vld [vmem:[#allocation11 + $0x70] sm:$0xff] }
0x13d9   :  { %1721 = vmatprep.mubr.f32.mxu1 %v3409_v0  ;;  %v3050_v18 = vpack.c.bf16 %v1618_v16, %v1616_v7 }
0x13db   :  { %3051 = vmatpush1.bf16.msra.mxu1 %v3050_v18 }
0x13dc   :  { %3094 = vmatprep.subr.bf16.mxu1 %v3413_v54 }
0x14a0   :  { %v3930_v17 = vpop.f32.mrb[12].mxu1 }
0x14a1   :  { %v1533_v4 = vpop.f32.mrb[13].mxu1 }
0x14a2   :  { %v1765_v4 = vld [vmem:[#allocation12 + $0x10] sm:$0xff] }
0x14a3   :  { %v3950_v19 = vpack.c.bf16 %v1766_v49, %v1765_v4 }
0x14ab   :  { %v1536_v24 = vpop.f32.mrb[14].mxu1 }
0x14ac   :  { %v1537_v25 = vpop.f32.mrb[15].mxu1 }
0x14ad   :  { %v1543_v28 = vadd.f32 %v1537_v25, %v154_v23 }
0x14af   :  { %v1545_v29 = vmul.f32 %v1543_v28, %v3626_v30 }
0x14b1   :  { %3199 = vtanh.f32 %v1545_v29  ;;  %v3976_v29 = vld [vmem:[%s4177_s4] sm:$0x3]  ;;  %s4190_s4 = scalar_lea.vmem [#allocation6], %s3596_s24 }
0x14bb   :  { %v3200_v31 = vpop.eup %3199 }
0x14bc   :  { %v1549_v32 = vmul.f32 %v3200_v31, %v3626_v30  ;;  %v3980_v31 = vrot.slane %v3976_v29, %v3594_v15 }
0x14be   :  { %v1551_v33 = vadd.f32 %v1549_v32, %v3634_v42 }
0x14c0   :  { %1558 = vrot.lane.b32.xlu0 %v1551_v33, %s3411_s5  ;;  %v1553_v40 = vmul.f32 %v1551_v33, %v1436_v55  ;;  %v3946_v55 = vpack.c.bf16 %v1764_v2, %v1763_v1 }
0x14c2   :  { %3054 = vmatpush3.bf16.msra.mxu0 %v3946_v55 }
0x14c3   :  { %3055 = vmatprep.subr.bf16.mxu0 %v3413_v54 }
0x14c6   :  { %3057 = vmatpush3.bf16.msra.mxu0 %v3950_v19 }
0x14c7   :  { %3058 = vmatprep.subr.bf16.mxu0 %v3413_v54 }
0x14c9   :  { %2874 = vmatmul.mubr.f32.vlgmr.msra.gmra.mrb[16].mxu0 %v3409_v0 }
0x14ca   :  { %3060 = vmatpush3.bf16.msra.mxu0 %v3946_v55  ;;  %2884 = vmatprep.mubr.msk.f32.mxu0 %vm3414_vm6, %v3409_v0 }
0x14cb   :  { %3061 = vmatprep.subr.bf16.mxu0 %v3413_v54 }
0x14ce   :  { %3063 = vmatpush3.bf16.msra.mxu0 %v3950_v19 }
0x14cf   :  { %3064 = vmatprep.subr.bf16.mxu0 %v3413_v54 }
0x1532   :  { %v1559_v35 = vpop.permute.xlu0 %1558 }
0x1533   :  { %v1563_v37 = vmul.f32 %v1559_v35, %v1551_v33 }
0x1535   :  { %1568 = vrot.lane.b32.xlu1 %v1563_v37, %s3412_s18 }
0x159c   :  { %v1833_v25 = vpop.f32.mrb[16].mxu0 }
0x159d   :  { %v2875_v28 = vpop.f32.mrb[17].mxu0 }
0x15a7   :  { %v1569_v41 = vpop.permute.xlu1 %1568 }
0x15a8   :  { %v1573_v38 = vadd.f32 %v1569_v41, %v1553_v40 }
0x15aa   :  { %3201 = vtanh.f32 %v1573_v38 }
0x15b4   :  { %v3202_v50 = vpop.eup %3201 }
0x15b5   :  { %1580 = vrot.lane.b32.xlu0 %v3202_v50, %s3411_s5 }
0x1627   :  { %v1581_v20 = vpop.permute.xlu0 %1580 }
0x1628   :  { %v1585_v22 = vmul.f32 %v1581_v20, %v1551_v33 }
0x162a   :  { %1592 = vrot.lane.b32.xlu1 %v1585_v22, %s3411_s5 }
0x169c   :  { %v1593_v23 = vpop.permute.xlu1 %1592 }
0x169d   :  { %1595 = vst.msk [vmem:[#allocation3] sm:$0xff] %vm635_vm7, %v1593_v23 }
0x16a4   :  { %v1596_v24 = vld [vmem:[#allocation3] sm:$0xff] }
0x16a5   :  { %2783 = vmatmul.mubr.msk.f32.vlgmr.msra.gmra.mrb[16].mxu1 %vm1632_vm8, %v1596_v24 }
0x16a6   :  { %1726 = vmatprep.mubr.f32.mxu1 %v3409_v0  ;;  %3096 = vmatpush3.bf16.msra.mxu1 %v3946_v55 }
0x16a7   :  { %3097 = vmatprep.subr.bf16.mxu1 %v3413_v54 }
0x16aa   :  { %3099 = vmatpush3.bf16.msra.mxu1 %v3950_v19 }
0x16ab   :  { %3100 = vmatprep.subr.bf16.mxu1 %v3413_v54 }
0x1778   :  { %v1723_v32 = vpop.f32.mrb[16].mxu1 }
0x1779   :  { %v1724_v33 = vadd.f32 %v1723_v32, %v3980_v31  ;;  %v1725_v35 = vpop.f32.mrb[17].mxu1 }
0x177b   :  { %v1837_v37 = vadd.f32 %v1833_v25, %v1724_v33 }
0x177d   :  { %v1838_v40 = vmul.f32 %v1837_v37, %v3626_v30 }
0x177f   :  { %3203 = vtanh.f32 %v1838_v40 }
0x1789   :  { %v3204_v41 = vpop.eup %3203 }
0x178a   :  { %v1840_v38 = vmul.f32 %v3204_v41, %v3626_v30 }
0x178c   :  { %v1841_v43 = vadd.f32 %v1840_v38, %v3634_v42 }
0x178e   :  { %1844 = vrot.lane.b32.xlu0 %v1841_v43, %s3411_s5  ;;  %v1842_v45 = vmul.f32 0.0, %v1841_v43 }
0x1800   :  { %v1845_v10 = vpop.permute.xlu0 %1844 }
0x1801   :  { %v1847_v11 = vmul.f32 %v1845_v10, %v1841_v43 }
0x1803   :  { %1849 = vrot.lane.b32.xlu1 %v1847_v11, %s3412_s18 }
0x1807   :  { %1455 = vrot.lane.b32.xlu1 %v3919_v13, %s3411_s5 }
0x1875   :  { %v1850_v39 = vpop.permute.xlu1 %1849 }
0x1876   :  { %v1852_v46 = vadd.f32 %v1850_v39, %v1842_v45 }
0x1878   :  { %3205 = vtanh.f32 %v1852_v46 }
0x1879   :  { %v1456_v8 = vpop.permute.xlu1 %1455 }
0x187a   :  { %1458 = vst.msk [vmem:[#allocation3 + $0x8] sm:$0xff] %vm635_vm7, %v1456_v8 }
0x1881   :  { %v1597_v48 = vld [vmem:[#allocation3 + $0x8] sm:$0xff] }
0x1882   :  { %v3206_v9 = vpop.eup %3205  ;;  %2784 = vmatmul.mubr.msk.f32.gmra.mrb[18].mxu1 %vm1632_vm8, %v1597_v48 }
0x1883   :  { %1855 = vrot.lane.b32.xlu0 %v3206_v9, %s3411_s5  ;;  %1731 = vmatprep.mubr.f32.mxu1 %v3409_v0 }
0x18f5   :  { %v1856_v3 = vpop.permute.xlu0 %1855 }
0x18f6   :  { %v1858_v5 = vmul.f32 %v1856_v3, %v1841_v43 }
0x18f8   :  { %1860 = vrot.lane.b32.xlu0 %v1858_v5, %s3412_s18 }
0x1955   :  { %v1728_v13 = vpop.f32.mrb[18].mxu1 }
0x1956   :  { %v1730_v12 = vpop.f32.mrb[19].mxu1  ;;  %v1729_v51 = vadd.f32 %v1728_v13, %v3980_v31 }
0x196a   :  { %v1861_v50 = vpop.permute.xlu0 %1860 }
0x196b   :  { %2885 = vmatmul.mubr.msk.f32.vlgmr.msra.gmra.mrb[18].mxu0 %vm501_vm5, %v1861_v50 }
0x196c   :  { %3066 = vmatpush3.bf16.msra.mxu0 %v3946_v55  ;;  %2895 = vmatprep.mubr.msk.f32.mxu0 %vm3414_vm6, %v3409_v0 }
0x196d   :  { %3067 = vmatprep.subr.bf16.mxu0 %v3413_v54 }
0x1970   :  { %3069 = vmatpush3.bf16.msra.mxu0 %v3950_v19 }
0x1971   :  { %3070 = vmatprep.subr.bf16.mxu0 %v3413_v54 }
0x1a3e   :  { %v1930_v60 = vpop.f32.mrb[18].mxu0 }
0x1a3f   :  { %v1934_v61 = vadd.f32 %v1930_v60, %v1729_v51  ;;  %v2886_v53 = vpop.f32.mrb[19].mxu0 }
0x1a41   :  { %v1935_v58 = vmul.f32 %v1934_v61, %v3626_v30 }
0x1a43   :  { %3207 = vtanh.f32 %v1935_v58 }
0x1a4d   :  { %v3208_v59 = vpop.eup %3207 }
0x1a4e   :  { %v1937_v1 = vmul.f32 %v3208_v59, %v3626_v30 }
0x1a50   :  { %v1938_v2 = vadd.f32 %v1937_v1, %v3634_v42 }
0x1a52   :  { %1941 = vrot.lane.b32.xlu1 %v1938_v2, %s3411_s5  ;;  %v1939_v7 = vmul.f32 %v1938_v2, %v1852_v46 }
0x1ac4   :  { %v1942_v56 = vpop.permute.xlu1 %1941 }
0x1ac5   :  { %v1944_v6 = vmul.f32 %v1942_v56, %v1938_v2 }
0x1ac7   :  { %1946 = vrot.lane.b32.xlu0 %v1944_v6, %s3412_s18 }
0x1acb   :  { %1318 = vrot.lane.b32.xlu0 %v3881_v26, %s3411_s5 }
0x1b39   :  { %v1947_v57 = vpop.permute.xlu0 %1946 }
0x1b3a   :  { %v1949_v16 = vadd.f32 %v1947_v57, %v1939_v7 }
0x1b3c   :  { %3209 = vtanh.f32 %v1949_v16 }
0x1b3d   :  { %v1319_v4 = vpop.permute.xlu0 %1318 }
0x1b3e   :  { %1321 = vst.msk [vmem:[#allocation3 + $0x10] sm:$0xff] %vm635_vm7, %v1319_v4 }
0x1b45   :  { %v1598_v49 = vld [vmem:[#allocation3 + $0x10] sm:$0xff] }
0x1b46   :  { %v3210_v18 = vpop.eup %3209  ;;  %2785 = vmatmul.mubr.msk.f32.gmra.mrb[20].mxu1 %vm1632_vm8, %v1598_v49 }
0x1b47   :  { %1952 = vrot.lane.b32.xlu1 %v3210_v18, %s3411_s5  ;;  %1736 = vmatprep.mubr.f32.mxu1 %v3409_v0 }
0x1bb9   :  { %v1953_v20 = vpop.permute.xlu1 %1952 }
0x1bba   :  { %v1955_v22 = vmul.f32 %v1953_v20, %v1938_v2 }
0x1bbc   :  { %1957 = vrot.lane.b32.xlu1 %v1955_v22, %s3412_s18 }
0x1c19   :  { %v1733_v26 = vpop.f32.mrb[20].mxu1 }
0x1c1a   :  { %v1735_v23 = vpop.f32.mrb[21].mxu1  ;;  %v1734_v25 = vadd.f32 %v1733_v26, %v3980_v31 }
0x1c2e   :  { %v1958_v24 = vpop.permute.xlu1 %1957 }
0x1c2f   :  { %2896 = vmatmul.mubr.msk.f32.vlgmr.msra.gmra.mrb[20].mxu0 %vm501_vm5, %v1958_v24 }
0x1c30   :  { %3072 = vmatpush3.bf16.msra.mxu0 %v3946_v55  ;;  %2906 = vmatprep.mubr.msk.f32.mxu0 %vm3414_vm6, %v3409_v0 }
0x1c31   :  { %3073 = vmatprep.subr.bf16.mxu0 %v3413_v54 }
0x1c34   :  { %3075 = vmatpush3.bf16.msra.mxu0 %v3950_v19 }
0x1c35   :  { %3076 = vmatprep.subr.bf16.mxu0 %v3413_v54 }
0x1d02   :  { %v2027_v28 = vpop.f32.mrb[20].mxu0 }
0x1d03   :  { %v2031_v32 = vadd.f32 %v2027_v28, %v1734_v25  ;;  %v2897_v33 = vpop.f32.mrb[21].mxu0 }
0x1d05   :  { %v2032_v35 = vmul.f32 %v2031_v32, %v3626_v30 }
0x1d07   :  { %3211 = vtanh.f32 %v2032_v35 }
0x1d11   :  { %v3212_v37 = vpop.eup %3211 }
0x1d12   :  { %v2034_v40 = vmul.f32 %v3212_v37, %v3626_v30 }
0x1d14   :  { %v2035_v41 = vadd.f32 %v2034_v40, %v3634_v42 }
0x1d16   :  { %2038 = vrot.lane.b32.xlu0 %v2035_v41, %s3411_s5  ;;  %v2036_v10 = vmul.f32 %v2035_v41, %v1949_v16 }
0x1d88   :  { %v2039_v38 = vpop.permute.xlu0 %2038 }
0x1d89   :  { %v2041_v43 = vmul.f32 %v2039_v38, %v2035_v41 }
0x1d8b   :  { %2043 = vrot.lane.b32.xlu1 %v2041_v43, %s3412_s18 }
0x1d8f   :  { %1181 = vrot.lane.b32.xlu1 %v3842_v44, %s3411_s5 }
0x1dfd   :  { %v2044_v11 = vpop.permute.xlu1 %2043 }
0x1dfe   :  { %v2046_v45 = vadd.f32 %v2044_v11, %v2036_v10 }
0x1e00   :  { %3213 = vtanh.f32 %v2046_v45 }
0x1e01   :  { %v1182_v39 = vpop.permute.xlu1 %1181 }
0x1e02   :  { %1184 = vst.msk [vmem:[#allocation3 + $0x18] sm:$0xff] %vm635_vm7, %v1182_v39 }
0x1e09   :  { %v1599_v46 = vld [vmem:[#allocation3 + $0x18] sm:$0xff] }
0x1e0a   :  { %v3214_v8 = vpop.eup %3213  ;;  %2786 = vmatmul.mubr.msk.f32.gmra.mrb[22].mxu1 %vm1632_vm8, %v1599_v46 }
0x1e0b   :  { %2049 = vrot.lane.b32.xlu0 %v3214_v8, %s3411_s5  ;;  %1741 = vmatprep.mubr.f32.mxu1 %v3409_v0 }
0x1e7d   :  { %v2050_v48 = vpop.permute.xlu0 %2049 }
0x1e7e   :  { %v2052_v9 = vmul.f32 %v2050_v48, %v2035_v41 }
0x1e80   :  { %2054 = vrot.lane.b32.xlu0 %v2052_v9, %s3412_s18 }
0x1edd   :  { %v1738_v44 = vpop.f32.mrb[22].mxu1 }
0x1ede   :  { %v1740_v3 = vpop.f32.mrb[23].mxu1  ;;  %v1739_v13 = vadd.f32 %v1738_v44, %v3980_v31 }
0x1ef2   :  { %v2055_v5 = vpop.permute.xlu0 %2054 }
0x1ef3   :  { %2907 = vmatmul.mubr.msk.f32.vlgmr.msra.gmra.mrb[22].mxu0 %vm501_vm5, %v2055_v5 }
0x1ef4   :  { %3078 = vmatpush3.bf16.msra.mxu0 %v3946_v55  ;;  %2917 = vmatprep.mubr.msk.f32.mxu0 %vm3414_vm6, %v3409_v0 }
0x1ef5   :  { %3079 = vmatprep.subr.bf16.mxu0 %v3413_v54 }
0x1ef8   :  { %3081 = vmatpush3.bf16.msra.mxu0 %v3950_v19 }
0x1ef9   :  { %3082 = vmatprep.subr.bf16.mxu0 %v3413_v54 }
0x1fc6   :  { %v2124_v12 = vpop.f32.mrb[22].mxu0 }
0x1fc7   :  { %v2128_v50 = vadd.f32 %v2124_v12, %v1739_v13  ;;  %v2908_v51 = vpop.f32.mrb[23].mxu0  ;;  %v3245_v13 = vld [vmem:[%s4190_s4] ss:$8 sm:$0x3] }
0x1fc8   :  { %v469_v12 = vrot.slane %v3245_v13, %v3594_v15 }
0x1fc9   :  { %v2129_v60 = vmul.f32 %v2128_v50, %v3626_v30 }
0x1fcb   :  { %3215 = vtanh.f32 %v2129_v60 }
0x1fd5   :  { %v3216_v61 = vpop.eup %3215 }
0x1fd6   :  { %v2131_v53 = vmul.f32 %v3216_v61, %v3626_v30 }
0x1fd8   :  { %v2132_v58 = vadd.f32 %v2131_v53, %v3634_v42 }
0x1fda   :  { %2135 = vrot.lane.b32.xlu1 %v2132_v58, %s3411_s5  ;;  %v2133_v2 = vmul.f32 %v2132_v58, %v2046_v45 }
0x204c   :  { %v2136_v59 = vpop.permute.xlu1 %2135 }
0x204d   :  { %v2138_v1 = vmul.f32 %v2136_v59, %v2132_v58 }
0x204f   :  { %2140 = vrot.lane.b32.xlu0 %v2138_v1, %s3412_s18 }
0x2053   :  { %1044 = vrot.lane.b32.xlu0 %v3806_v36, %s3411_s5 }
0x20c1   :  { %v2141_v56 = vpop.permute.xlu0 %2140 }
0x20c2   :  { %v2143_v6 = vadd.f32 %v2141_v56, %v2133_v2 }
0x20c4   :  { %3217 = vtanh.f32 %v2143_v6 }
0x20c5   :  { %v1045_v7 = vpop.permute.xlu0 %1044 }
0x20c6   :  { %1047 = vst.msk [vmem:[#allocation3 + $0x20] sm:$0xff] %vm635_vm7, %v1045_v7 }
0x20c7   :  { %1179 = vst.msk [vmem:[#allocation3 + $0x20] sm:$0xff] %vm501_vm5, %v3846_v34 }
0x20ce   :  { %v3218_v57 = vpop.eup %3217  ;;  %v1600_v16 = vld [vmem:[#allocation3 + $0x20] sm:$0xff] }
0x20cf   :  { %2787 = vmatmul.mubr.msk.f32.gmra.mrb[24].mxu1 %vm1632_vm8, %v1600_v16  ;;  %2146 = vrot.lane.b32.xlu1 %v3218_v57, %s3411_s5 }
0x20d0   :  { %1746 = vmatprep.mubr.f32.mxu1 %v3409_v0 }
0x2141   :  { %v2147_v4 = vpop.permute.xlu1 %2146 }
0x2142   :  { %v2149_v36 = vmul.f32 %v2147_v4, %v2132_v58 }
0x2144   :  { %2151 = vrot.lane.b32.xlu1 %v2149_v36, %s3412_s18 }
0x21a2   :  { %v1743_v49 = vpop.f32.mrb[24].mxu1 }
0x21a3   :  { %v1745_v18 = vpop.f32.mrb[25].mxu1  ;;  %v1744_v34 = vadd.f32 %v1743_v49, %v3980_v31 }
0x21b6   :  { %v2152_v20 = vpop.permute.xlu1 %2151 }
0x21b7   :  { %2918 = vmatmul.mubr.msk.f32.vlgmr.msra.gmra.mrb[24].mxu0 %vm501_vm5, %v2152_v20 }
0x21b8   :  { %3084 = vmatpush3.bf16.msra.mxu0 %v3946_v55  ;;  %2928 = vmatprep.mubr.msk.f32.mxu0 %vm3414_vm6, %v3409_v0 }
0x21b9   :  { %3085 = vmatprep.subr.bf16.mxu0 %v3413_v54 }
0x21bc   :  { %3087 = vmatpush3.bf16.msra.mxu0 %v3950_v19 }
0x21bd   :  { %3088 = vmatprep.subr.bf16.mxu0 %v3413_v54 }
0x228a   :  { %v2221_v22 = vpop.f32.mrb[24].mxu0 }
0x228b   :  { %v2225_v26 = vadd.f32 %v2221_v22, %v1744_v34  ;;  %v2919_v23 = vpop.f32.mrb[25].mxu0 }
0x228d   :  { %v2226_v24 = vmul.f32 %v2225_v26, %v3626_v30 }
0x228f   :  { %3219 = vtanh.f32 %v2226_v24 }
0x2299   :  { %v3220_v25 = vpop.eup %3219 }
0x229a   :  { %v2228_v28 = vmul.f32 %v3220_v25, %v3626_v30 }
0x229c   :  { %v2229_v32 = vadd.f32 %v2228_v28, %v3634_v42 }
0x229e   :  { %2232 = vrot.lane.b32.xlu0 %v2229_v32, %s3411_s5  ;;  %v2230_v37 = vmul.f32 %v2229_v32, %v2143_v6 }
0x2310   :  { %v2233_v33 = vpop.permute.xlu0 %2232 }
0x2311   :  { %v2235_v35 = vmul.f32 %v2233_v33, %v2229_v32 }
0x2313   :  { %2237 = vrot.lane.b32.xlu1 %v2235_v35, %s3412_s18 }
0x2317   :  { %907 = vrot.lane.b32.xlu1 %v3761_v47, %s3411_s5 }
0x2385   :  { %v2238_v40 = vpop.permute.xlu1 %2237 }
0x2386   :  { %v2240_v41 = vadd.f32 %v2238_v40, %v2230_v37 }
0x2388   :  { %3221 = vtanh.f32 %v2240_v41 }
0x2389   :  { %v908_v38 = vpop.permute.xlu1 %907 }
0x238a   :  { %910 = vst.msk [vmem:[#allocation3 + $0x28] sm:$0xff] %vm635_vm7, %v908_v38 }
0x238b   :  { %1316 = vst.msk [vmem:[#allocation3 + $0x28] sm:$0xff] %vm501_vm5, %v3885_v27 }
0x2392   :  { %v3222_v43 = vpop.eup %3221  ;;  %v1601_v10 = vld [vmem:[#allocation3 + $0x28] sm:$0xff] }
0x2393   :  { %2788 = vmatmul.mubr.msk.f32.gmra.mrb[26].mxu1 %vm1632_vm8, %v1601_v10  ;;  %2243 = vrot.lane.b32.xlu0 %v3222_v43, %s3411_s5 }
0x2394   :  { %1751 = vmatprep.mubr.f32.mxu1 %v3409_v0 }
0x2405   :  { %v2244_v11 = vpop.permute.xlu0 %2243 }
0x2406   :  { %v2246_v47 = vmul.f32 %v2244_v11, %v2229_v32 }
0x2408   :  { %2248 = vrot.lane.b32.xlu0 %v2246_v47, %s3412_s18 }
0x2466   :  { %v1748_v45 = vpop.f32.mrb[26].mxu1 }
0x2467   :  { %v1750_v39 = vpop.f32.mrb[27].mxu1  ;;  %v1749_v27 = vadd.f32 %v1748_v45, %v3980_v31 }
0x247a   :  { %v2249_v46 = vpop.permute.xlu0 %2248 }
0x247b   :  { %2929 = vmatmul.mubr.msk.f32.vlgmr.msra.gmra.mrb[26].mxu0 %vm501_vm5, %v2249_v46 }
0x247c   :  { %3090 = vmatpush3.bf16.msra.mxu0 %v3946_v55  ;;  %2939 = vmatprep.mubr.msk.f32.mxu0 %vm3414_vm6, %v3409_v0 }
0x247d   :  { %3091 = vmatprep.subr.bf16.mxu0 %v3413_v54 }
0x2480   :  { %3093 = vmatpush3.bf16.msra.mxu0 %v3950_v19  ;;  %v3246_v19 = vld [vmem:[%s4191_s2] ss:$8 sm:$0x3] }
0x2481   :  { %v480_v50 = vrot.slane %v3246_v19, %v3594_v15 }
0x2483   :  { %v487_v51 = vsel %vm149_vm0, %v469_v12, %v480_v50 }
0x2484   :  { %v489_v60 = vsel %vm152_vm3, %v487_v51, 0.0 }
0x2485   :  { %v1541_v61 = vadd.f32 %v3930_v17, %v489_v60 }
0x2487   :  { %v1544_v53 = vmul.f32 %v1541_v61, %v3626_v30 }
0x254e   :  { %v2318_v8 = vpop.f32.mrb[26].mxu0 }
0x254f   :  { %v2322_v48 = vadd.f32 %v2318_v8, %v1749_v27  ;;  %v2930_v9 = vpop.f32.mrb[27].mxu0 }
0x2550   :  { %v1629_v9 = vrot.slane %v3976_v29, %v3608_v21 }
0x2551   :  { %v2323_v44 = vmul.f32 %v2322_v48, %v3626_v30 }
0x2553   :  { %3223 = vtanh.f32 %v2323_v44 }
0x2554   :  { %3225 = vtanh.f32 %v1544_v53 }
0x255d   :  { %v3224_v3 = vpop.eup %3223 }
0x255e   :  { %v2325_v5 = vmul.f32 %v3224_v3, %v3626_v30  ;;  %v3226_v1 = vpop.eup %3225 }
0x255f   :  { %v1548_v2 = vmul.f32 %v3226_v1, %v3626_v30 }
0x2560   :  { %v2326_v55 = vadd.f32 %v2325_v5, %v3634_v42 }
0x2561   :  { %v1550_v15 = vadd.f32 %v1548_v2, %v3634_v42 }
0x2562   :  { %2329 = vrot.lane.b32.xlu1 %v2326_v55, %s3411_s5  ;;  %v2327_v56 = vmul.f32 %v2326_v55, %v2240_v41 }
0x2563   :  { %v1552_v36 = vmul.f32 %v1550_v15, %v3913_v62 }
0x25d4   :  { %v2330_v58 = vpop.permute.xlu1 %2329 }
0x25d5   :  { %v2332_v59 = vmul.f32 %v2330_v58, %v2326_v55 }
0x25d7   :  { %2334 = vrot.lane.b32.xlu0 %v2332_v59, %s3412_s18 }
0x25db   :  { %770 = vrot.lane.b32.xlu0 %v3707_v52, %s3411_s5 }
0x25df   :  { %1556 = vrot.lane.b32.xlu0 %v1550_v15, %s3411_s5 }
0x2649   :  { %v2335_v6 = vpop.permute.xlu0 %2334 }
0x264a   :  { %v2337_v17 = vadd.f32 %v2335_v6, %v2327_v56 }
0x264c   :  { %3227 = vtanh.f32 %v2337_v17 }
0x264d   :  { %v771_v7 = vpop.permute.xlu0 %770 }
0x264e   :  { %773 = vst.msk [vmem:[#allocation3 + $0x30] sm:$0xff] %vm635_vm7, %v771_v7 }
0x264f   :  { %1453 = vst.msk [vmem:[#allocation3 + $0x30] sm:$0xff] %vm501_vm5, %v3923_v14 }
0x2651   :  { %v1557_v57 = vpop.permute.xlu0 %1556 }
0x2652   :  { %v1562_v16 = vmul.f32 %v1557_v57, %v1550_v15  ;;  %v2568_v57 = vld [vmem:[#allocation14] sm:$0xff] }
0x2654   :  { %1566 = vrot.lane.b32.xlu0 %v1562_v16, %s3412_s18  ;;  %v2569_v16 = vld [vmem:[#allocation14 + $0x8] sm:$0xff] }
0x2656   :  { %v3228_v4 = vpop.eup %3227  ;;  %v1602_v52 = vld [vmem:[#allocation3 + $0x30] sm:$0xff] }
0x2657   :  { %2789 = vmatmul.mubr.msk.f32.gmra.mrb[28].mxu1 %vm1632_vm8, %v1602_v52  ;;  %2340 = vrot.lane.b32.xlu1 %v3228_v4, %s3411_s5  ;;  %v2570_v4 = vld [vmem:[#allocation14 + $0x10] sm:$0xff]  ;;  %v3101_v52 = vpack.c.bf16 %v2569_v16, %v2568_v57 }
0x2658   :  { %1756 = vmatprep.mubr.f32.mxu1 %v3409_v0 }
0x26c6   :  { %v1567_v49 = vpop.permute.xlu0 %1566 }
0x26c7   :  { %v1572_v18 = vadd.f32 %v1567_v49, %v1552_v36  ;;  %v2571_v36 = vld [vmem:[#allocation14 + $0x18] sm:$0xff] }
0x26c8   :  { %v3104_v49 = vpack.c.bf16 %v2571_v36, %v2570_v4 }
0x26c9   :  { %3229 = vtanh.f32 %v1572_v18  ;;  %v2341_v20 = vpop.permute.xlu1 %2340  ;;  %v2572_v18 = vld [vmem:[#allocation14 + $0x20] sm:$0xff] }
0x26ca   :  { %v2343_v34 = vmul.f32 %v2341_v20, %v2326_v55  ;;  %v2573_v20 = vld [vmem:[#allocation14 + $0x28] sm:$0xff] }
0x26cc   :  { %2345 = vrot.lane.b32.xlu1 %v2343_v34, %s3412_s18  ;;  %v3107_v34 = vpack.c.bf16 %v2573_v20, %v2572_v18 }
0x26d3   :  { %v3230_v14 = vpop.eup %3229 }
0x26d4   :  { %1578 = vrot.lane.b32.xlu0 %v3230_v14, %s3411_s5  ;;  %v2574_v14 = vld [vmem:[#allocation14 + $0x30] sm:$0xff] }
0x26d8   :  { %632 = vrot.lane.b32.xlu0 %v3653_v63, %s3411_s5 }
0x272a   :  { %v1753_v22 = vpop.f32.mrb[28].mxu1 }
0x272b   :  { %v1755_v26 = vpop.f32.mrb[29].mxu1  ;;  %v1754_v25 = vadd.f32 %v1753_v22, %v3980_v31  ;;  %v2575_v22 = vld [vmem:[#allocation14 + $0x38] sm:$0xff] }
0x273e   :  { %v2346_v23 = vpop.permute.xlu1 %2345 }
0x273f   :  { %2940 = vmatmul.mubr.msk.f32.vlgmr.msra.gmra.mrb[28].mxu0 %vm501_vm5, %v2346_v23  ;;  %v3110_v23 = vpack.c.bf16 %v2575_v22, %v2574_v14 }
0x2746   :  { %v1579_v24 = vpop.permute.xlu0 %1578 }
0x2747   :  { %v1584_v45 = vmul.f32 %v1579_v24, %v1550_v15 }
0x274a   :  { %v633_v62 = vpop.permute.xlu0 %632 }
0x274b   :  { %636 = vst.msk [vmem:[#allocation3 + $0x38] sm:$0xff] %vm635_vm7, %v633_v62 }
0x2812   :  { %v2415_v28 = vpop.f32.mrb[28].mxu0 }
0x2813   :  { %v2419_v32 = vadd.f32 %v2415_v28, %v1754_v25  ;;  %v2941_v33 = vpop.f32.mrb[29].mxu0 }
0x2815   :  { %v2420_v35 = vmul.f32 %v2419_v32, %v3626_v30 }
0x2817   :  { %3231 = vtanh.f32 %v2420_v35  ;;  %v2798_v35 = vld [vmem:[%s4180_s7] ss:$0 sm:$0xff] }
0x2821   :  { %v3232_v37 = vpop.eup %3231 }
0x2822   :  { %v2422_v63 = vmul.f32 %v3232_v37, %v3626_v30 }
0x2824   :  { %v2423_v40 = vadd.f32 %v2422_v63, %v3634_v42 }
0x2826   :  { %2426 = vrot.lane.b32.xlu1 %v2423_v40, %s3411_s5  ;;  %v2424_v43 = vmul.f32 %v2423_v40, %v2337_v17 }
0x2898   :  { %v2427_v41 = vpop.permute.xlu1 %2426 }
0x2899   :  { %v2429_v38 = vmul.f32 %v2427_v41, %v2423_v40 }
0x289b   :  { %2431 = vrot.lane.b32.xlu1 %v2429_v38, %s3412_s18 }
0x290d   :  { %v2432_v10 = vpop.permute.xlu1 %2431 }
0x290e   :  { %v2434_v11 = vadd.f32 %v2432_v10, %v2424_v43 }
0x2910   :  { %3233 = vtanh.f32 %v2434_v11 }
0x291a   :  { %v3234_v47 = vpop.eup %3233 }
0x291b   :  { %2437 = vrot.lane.b32.xlu1 %v3234_v47, %s3411_s5 }
0x291f   :  { %1587 = vrot.lane.b32.xlu1 %v1584_v45, %s3412_s18 }
0x298d   :  { %v2438_v39 = vpop.permute.xlu1 %2437 }
0x298e   :  { %v2440_v46 = vmul.f32 %v2438_v39, %v2423_v40 }
0x2990   :  { %2442 = vrot.lane.b32.xlu0 %v2440_v46, %s3412_s18 }
0x2991   :  { %v1588_v27 = vpop.permute.xlu1 %1587 }
0x2992   :  { %1590 = vst.msk [vmem:[#allocation3 + $0x38] sm:$0xff] %vm501_vm5, %v1588_v27 }
0x2999   :  { %v1603_v8 = vld [vmem:[#allocation3 + $0x38] sm:$0xff] }
0x299a   :  { %2790 = vmatmul.mubr.msk.f32.gmra.mrb[30].mxu1 %vm1632_vm8, %v1603_v8 }
0x299b   :  { %2950 = vmatprep.mubr.msk.f32.mxu1 %vm3414_vm6, %v3409_v0 }
0x2a02   :  { %v2443_v48 = vpop.permute.xlu0 %2442 }
0x2a03   :  { %2951 = vmatmul.mubr.msk.f32.vlgmr.msra.gmra.mrb[32].mxu1 %vm501_vm5, %v2443_v48 }
0x2a04   :  { %2969 = vmatprep.mubr.msk.f32.mxu1 %vm3414_vm6, %v3409_v0  ;;  %3102 = vmatpush3.bf16.msra.mxu1 %v3101_v52 }
0x2a05   :  { %3103 = vmatprep.subr.bf16.mxu1 %v3413_v54 }
0x2a08   :  { %3105 = vmatpush3.bf16.msra.mxu1 %v3104_v49 }
0x2a09   :  { %3106 = vmatprep.subr.bf16.mxu1 %v3413_v54 }
0x2a0c   :  { %3108 = vmatpush3.bf16.msra.mxu1 %v3107_v34 }
0x2a0d   :  { %3109 = vmatprep.subr.bf16.mxu1 %v3413_v54 }
0x2a10   :  { %3111 = vmatpush3.bf16.msra.mxu1 %v3110_v23 }
0x2a6d   :  { %v1758_v44 = vpop.f32.mrb[30].mxu1 }
0x2a6e   :  { %v1760_v3 = vpop.f32.mrb[31].mxu1  ;;  %v1759_v50 = vadd.f32 %v1758_v44, %v3980_v31 }
0x2a6f   :  { %v1761_v5 = vadd.f32 %v1760_v3, %v1629_v9 }
0x2a71   :  { %v2538_v55 = vmul.f32 %v1761_v5, %v3626_v30 }
0x2a73   :  { %3235 = vtanh.f32 %v2538_v55 }
0x2a7d   :  { %v3236_v13 = vpop.eup %3235 }
0x2a7e   :  { %v2540_v12 = vmul.f32 %v3236_v13, %v3626_v30 }
0x2a80   :  { %v2541_v19 = vadd.f32 %v2540_v12, %v3634_v42 }
0x2a82   :  { %2544 = vrot.lane.b32.xlu0 %v2541_v19, %s3411_s5  ;;  %v2542_v31 = vmul.f32 0.0, %v2541_v19 }
0x2ad6   :  { %v2512_v51 = vpop.f32.mrb[32].mxu1 }
0x2ad7   :  { %v2516_v0 = vadd.f32 %v2512_v51, %v1759_v50  ;;  %v2952_v60 = vpop.f32.mrb[33].mxu1 }
0x2ad9   :  { %v2517_v21 = vmul.f32 %v2516_v0, %v3626_v30 }
0x2adb   :  { %3237 = vtanh.f32 %v2517_v21 }
0x2ae5   :  { %v3238_v29 = vpop.eup %3237 }
0x2ae6   :  { %v2519_v61 = vmul.f32 %v3238_v29, %v3626_v30 }
0x2ae8   :  { %v2520_v53 = vadd.f32 %v2519_v61, %v3634_v42 }
0x2aea   :  { %2523 = vrot.lane.b32.xlu1 %v2520_v53, %s3411_s5  ;;  %v2521_v30 = vmul.f32 %v2520_v53, %v2434_v11 }
0x2af4   :  { %v2545_v58 = vpop.permute.xlu0 %2544 }
0x2af5   :  { %v2547_v59 = vmul.f32 %v2545_v58, %v2541_v19 }
0x2af7   :  { %2549 = vrot.lane.b32.xlu0 %v2547_v59, %s3412_s18 }
0x2b5c   :  { %v2524_v1 = vpop.permute.xlu1 %2523 }
0x2b5d   :  { %v2526_v2 = vmul.f32 %v2524_v1, %v2520_v53 }
0x2b5f   :  { %2528 = vrot.lane.b32.xlu1 %v2526_v2, %s3412_s18 }
0x2b69   :  { %v2550_v15 = vpop.permute.xlu0 %2549 }
0x2b6a   :  { %v2552_v56 = vadd.f32 %v2550_v15, %v2542_v31 }
0x2b6c   :  { %3239 = vtanh.f32 %v2552_v56 }
0x2b76   :  { %v3240_v6 = vpop.eup %3239 }
0x2b77   :  { %2555 = vrot.lane.b32.xlu0 %v3240_v6, %s3411_s5 }
0x2bd1   :  { %v2529_v17 = vpop.permute.xlu1 %2528 }
0x2bd2   :  { %v2531_v42 = vadd.f32 %v2529_v17, %v2521_v30 }
0x2bd4   :  { %3241 = vtanh.f32 %v2531_v42 }
0x2bde   :  { %v3242_v7 = vpop.eup %3241 }
0x2bdf   :  { %2534 = vrot.lane.b32.xlu1 %v3242_v7, %s3411_s5 }
0x2be9   :  { %v2556_v26 = vpop.permute.xlu0 %2555 }
0x2bea   :  { %v2558_v24 = vmul.f32 %v2556_v26, %v2541_v19 }
0x2bec   :  { %2564 = vrot.lane.b32.xlu0 %v2558_v24, %s3411_s5  ;;  %s3367_s5 = scalar_lea.vmem %s2664_s0, 128 }
0x2bed   :  { %p3368_p1 = scmp.ne.s32.totalorder %s2664_s0, %s3367_s5  ;;  %p3373_p3 = scmp.lt.s32.totalorder %s3367_s5, %s3367_s5 }
0x2bef   :  { %p3374_p4 = por %p3373_p3, %p3372_p2 }
0x2bf1   :  { %p3375_p5 = pnand %p3374_p4, %p3368_p1 }
0x2c51   :  { %v2535_v62 = vpop.permute.xlu1 %2534 }
0x2c52   :  { %v2537_v25 = vmul.f32 %v2535_v62, %v2520_v53 }
0x2c54   :  { %2560 = vrot.lane.b32.xlu1 %v2537_v25, %s3412_s18 }
0x2c5e   :  { %v2565_v28 = vpop.permute.xlu0 %2564 }
0x2cc6   :  { %v2561_v32 = vpop.permute.xlu1 %2560 }
0x2cc7   :  { %v2567_v33 = vsel %vm501_vm5, %v2561_v32, %v2565_v28 }
0x2cc8   :  { %2970 = vmatmul.mubr.msk.f32.vlgmr.msra.gmra.mrb[34].mxu1 %vm1632_vm8, %v2567_v33 }
0x2d9b   :  { %v2652_v54 = vpop.f32.mrb[34].mxu1 }
0x2d9c   :  { %v2653_v37 = vadd.f32 %v2798_v35, %v2652_v54  ;;  %v2971_v63 = vpop.f32.mrb[35].mxu1 }
0x2d9e   :  { %2656 = vst [vmem:[#allocation15] sm:$0xff] %v2653_v37 }
0x2d9f   :  { %3378 = shalt.err (!%p3375_p5)
}
0x2da0   :  { %s3379_s11 = scalar_lea.hbm %s4181_s8, 128 }
0x2da1   :  { %p3380_p6 = scmp.ne.s32.totalorder %s4181_s8, %s3379_s11  ;;  %p3383_p7 = scmp.lt.u32.totalorder %s3379_s11, %s4181_s8 }
0x2da3   :  { %p3385_p8 = pnand %p3383_p7, %p3380_p6 }
0x2da5   :  { %3388 = shalt.err (!%p3385_p8)
}
0x2da6   :  { %2666 = dma.vmem_to_hbm [thread:$0]  %s2664_s0, 128, %s4181_s8, [#allocation8]  }
0x2da7   :  { %3397 = dma.done.wait [#allocation8], 128  }
0x2da8   :  { %3398 = vsyncadd [#allocation8], 4294967168 }
0x2da9   :  { %2670 = vsyncpa [#allocation7], 1 }
0x2daa   :  { %2671 = vsyncpa [#allocation10], 1 }
0x2dab   :  { %2672 = vsyncpa [#allocation13], 1 }
0x2dac   :  { %2673 = vsyncpa [#allocation8], 1 }

</bundles_post_ra>
